<compile_context>
chip_gen: v6e
topology: v6e:2x2x1
jax: 0.10.0
libtpu: 0.0.40
codegen_flags: <defaults>
</compile_context>

<pallas_src>
import jax
import jax.numpy as jnp
from jax.experimental import pallas as pl
from jax.experimental.pallas import tpu as pltpu

# ---------------- hyper-params (small, consistent with the module) ------------
NUM_WORDS = 100       # args.num_words
VOCAB_PAD = 128       # vocab padded to lane width for the one-hot matmul
EMBED_DIM = 32        # args.embedding_dim  (== LSTM hidden size)
NUM_LAYERS = 2        # args.num_layers
NUM_CLASS = 18
CLASS_PAD = 128       # lane-dense logits, sliced back to 18 in the wrapper
FC1_DIM = 64
HEAD_PAD = 128        # fc1 output padded to full lane width
BATCH = 2
BATCH_PAD = 8         # fill all 8 f32 sublanes
SEQ_LEN = 8


def lstm_head_kernel(tok_ref,       # (T*Bp, VOCAB_PAD) int32  time-major tokens, lane-broadcast
                     emb_wih0_ref,  # (VOCAB_PAD, 4E) bf16     emb @ W_ih0.T (row 0 == 0)
                     b0_ref,        # (1, 4E) f32              b_ih0 + b_hh0
                     w_fused_ref,   # (E, 8E) bf16             [W_hh0.T | W_ih1.T], contiguous
                     w_hh1_ref,     # (E, 4E) bf16             W_hh1.T
                     b1_ref,        # (1, 4E) f32              b_ih1 + b_hh1
                     fc1_w_ref,     # (E, HEAD_PAD) bf16       zero past 64
                     fc1_b_ref,     # (1, HEAD_PAD) f32        zero past 64
                     fc2_w_ref,     # (HEAD_PAD, CLASS_PAD) bf16  zero past (64, 18)
                     fc2_b_ref,     # (1, CLASS_PAD) f32       zero past 18
                     out_ref):      # (Bp, CLASS_PAD) f32
    TB, Vp = tok_ref.shape
    E = w_hh1_ref.shape[0]          # 32
    G = 4 * E                       # 128
    Bp = out_ref.shape[0]           # 8
    T = TB // Bp

    # ---- Embedding gather fused with layer-0 input projection (one MXU pass) --
    col = jax.lax.broadcasted_iota(jnp.int32, (TB, Vp), 1)
    onehot = jnp.where(tok_ref[...] == col, 1.0, 0.0).astype(jnp.bfloat16)    # (TB, Vp)
    xproj0 = jnp.dot(onehot, emb_wih0_ref[...],
                     preferred_element_type=jnp.float32) + b0_ref[...]        # (TB, 4E) f32

    w_fused = w_fused_ref[...]      # (E, 8E) bf16
    w_hh1 = w_hh1_ref[...]          # (E, 4E) bf16
    b1 = b1_ref[...]                # (1, 4E) f32

    def cell(gates, c):
        # gate math stays f32 (sigmoid/tanh on the EUP, full 128-lane rows)
        sg = jax.nn.sigmoid(gates)
        tg = jnp.tanh(gates)
        i_g = sg[:, 0 * E:1 * E]
        f_g = sg[:, 1 * E:2 * E]
        g_g = tg[:, 2 * E:3 * E]
        o_g = sg[:, 3 * E:4 * E]
        c_new = f_g * c + i_g * g_g
        h_new = o_g * jnp.tanh(c_new)
        return h_new, c_new

    # ---- Wavefronted 2-layer LSTM, h0 = c0 = 0 (T is a tiny static count) -----
    c1 = jnp.zeros((Bp, E), jnp.float32)
    c2 = jnp.zeros((Bp, E), jnp.float32)
    rec1 = None                     # h1_{t-1} @ W_hh0
    h2b = None                      # h2_{t-1} in bf16

    for t in range(T):
        # layer-1 cell at step t
        xp = xproj0[t * Bp:(t + 1) * Bp, :]
        gates1 = xp if rec1 is None else xp + rec1
        h1, c1 = cell(gates1, c1)
        h1b = h1.astype(jnp.bfloat16)                     # single cast, feeds fused MXU pass

        # one 256-wide MXU pass: [h1_t @ W_hh0 | h1_t @ W_ih1]
        fused = jnp.dot(h1b, w_fused, preferred_element_type=jnp.float32)   # (Bp, 8E)
        rec1 = fused[:, :G]                               # -> layer-1 step t+1

        # layer-2 cell at step t (depends only on h1_t and h2_{t-1} -> overlaps
        # with layer-1 step t+1 on the serial critical path)
        gates2 = fused[:, G:] + b1
        if h2b is not None:
            gates2 = gates2 + jnp.dot(h2b, w_hh1, preferred_element_type=jnp.float32)
        h2, c2 = cell(gates2, c2)
        h2b = h2.astype(jnp.bfloat16)

    # TODO(synk): nn.Dropout(0.5) treated as inference-mode identity.

    # ---- Head: fc1 + ReLU, fc2 (full-lane padded, unmasked vregs) --------------
    hid = jnp.dot(h2b, fc1_w_ref[...],
                  preferred_element_type=jnp.float32) + fc1_b_ref[...]       # (Bp, 128)
    hid = jnp.maximum(hid, 0.0)                            # relu_
    logits = jnp.dot(hid.astype(jnp.bfloat16), fc2_w_ref[...],
                     preferred_element_type=jnp.float32) + fc2_b_ref[...]    # (Bp, 128)
    out_ref[...] = logits.astype(out_ref.dtype)


def prepare_params(p):
    """One-time layout plumbing outside the kernel: fold / transpose / pad / cast."""
    emb = jnp.zeros((VOCAB_PAD, EMBED_DIM), jnp.float32).at[:NUM_WORDS].set(p["embedding"])

    # Fold embedding into layer-0's input projection (precompute in f32, cast once).
    emb_wih0 = emb @ p["w_ih"][0].T                                          # (VOCAB_PAD, 4E) f32

    # Fused per-step RHS: [W_hh(layer0) | W_ih(layer1)] -> contiguous (E, 8E).
    w_fused = jnp.concatenate([p["w_hh"][0].T, p["w_ih"][1].T], axis=1)      # (E, 8E) f32

    b0 = (p["b_ih"][0] + p["b_hh"][0]).astype(jnp.float32)                   # (1, 4E)
    b1 = (p["b_ih"][1] + p["b_hh"][1]).astype(jnp.float32)                   # (1, 4E)

    # Lane-padded FC head (zero padding -> padded lanes stay exactly zero).
    fc1_w = jnp.zeros((EMBED_DIM, HEAD_PAD), jnp.float32).at[:, :FC1_DIM].set(p["fc1_w"].T)
    fc1_b = jnp.zeros((1, HEAD_PAD), jnp.float32).at[:, :FC1_DIM].set(p["fc1_b"])
    fc2_w = jnp.zeros((HEAD_PAD, CLASS_PAD), jnp.float32).at[:FC1_DIM, :NUM_CLASS].set(p["fc2_w"].T)
    fc2_b = jnp.zeros((1, CLASS_PAD), jnp.float32).at[:, :NUM_CLASS].set(p["fc2_b"])

    return {
        "emb_wih0": emb_wih0.astype(jnp.bfloat16),   # (128, 128)
        "b0": b0,                                    # (1, 128)
        "w_fused": w_fused.astype(jnp.bfloat16),     # (32, 256)
        "w_hh1": p["w_hh"][1].T.astype(jnp.bfloat16),# (32, 128)
        "b1": b1,                                    # (1, 128)
        "fc1_w": fc1_w.astype(jnp.bfloat16),         # (32, 128)
        "fc1_b": fc1_b,                              # (1, 128)
        "fc2_w": fc2_w.astype(jnp.bfloat16),         # (128, 128)
        "fc2_b": fc2_b,                              # (1, 128)
    }


def text_classification_forward(tokens, prep):
    """tokens: (B, T) int32; prep: output of prepare_params."""
    B, T = tokens.shape
    # Pad batch to 8 sublanes with token 0 (its folded projection row is zero);
    # padded rows are garbage after the biases but are sliced off below.
    tok_p = jnp.zeros((BATCH_PAD, T), jnp.int32).at[:B].set(tokens)
    tok_tm = tok_p.T.reshape(T * BATCH_PAD, 1)       # time-major flat (row = t*Bp + b)
    # Pre-broadcast across the 128 lanes on the host side: same VMEM footprint as
    # the padded (TB,1) block, but no in-kernel cross-lane (XLU) broadcast.
    tok_b = jnp.broadcast_to(tok_tm, (T * BATCH_PAD, VOCAB_PAD))

    vmem = pl.BlockSpec(memory_space=pltpu.MemorySpace.VMEM)
    out_pad = pl.pallas_call(
        lstm_head_kernel,
        out_shape=jax.ShapeDtypeStruct((BATCH_PAD, CLASS_PAD), jnp.float32),
        in_specs=[vmem] * 10,
        out_specs=vmem,
    )(tok_b, prep["emb_wih0"], prep["b0"], prep["w_fused"], prep["w_hh1"], prep["b1"],
      prep["fc1_w"], prep["fc1_b"], prep["fc2_w"], prep["fc2_b"])

    return out_pad[:B, :NUM_CLASS]


def init_params(key):
    """Parameters in PyTorch layout (out_features, in_features)."""
    ks = jax.random.split(key, 10)
    scale = 1.0 / jnp.sqrt(EMBED_DIM)

    emb = jax.random.normal(ks[0], (NUM_WORDS, EMBED_DIM), jnp.float32)
    emb = emb.at[0].set(0.0)                                   # padding_idx=0

    w_ih = scale * jax.random.normal(ks[1], (NUM_LAYERS, 4 * EMBED_DIM, EMBED_DIM), jnp.float32)
    w_hh = scale * jax.random.normal(ks[2], (NUM_LAYERS, 4 * EMBED_DIM, EMBED_DIM), jnp.float32)
    b_ih = scale * jax.random.normal(ks[3], (NUM_LAYERS, 1, 4 * EMBED_DIM), jnp.float32)
    b_hh = scale * jax.random.normal(ks[4], (NUM_LAYERS, 1, 4 * EMBED_DIM), jnp.float32)

    fc1_w = scale * jax.random.normal(ks[5], (FC1_DIM, EMBED_DIM), jnp.float32)
    fc1_b = scale * jax.random.normal(ks[6], (1, FC1_DIM), jnp.float32)
    fc2_w = (1.0 / jnp.sqrt(FC1_DIM)) * jax.random.normal(ks[7], (NUM_CLASS, FC1_DIM), jnp.float32)
    fc2_b = (1.0 / jnp.sqrt(FC1_DIM)) * jax.random.normal(ks[8], (1, NUM_CLASS), jnp.float32)

    return {
        "embedding": emb,
        "w_ih": w_ih, "w_hh": w_hh, "b_ih": b_ih, "b_hh": b_hh,
        "fc1_w": fc1_w, "fc1_b": fc1_b, "fc2_w": fc2_w, "fc2_b": fc2_b,
    }


if __name__ == "__main__":
    key = jax.random.PRNGKey(0)
    k_tok, k_par = jax.random.split(key)

    tokens = jax.random.randint(k_tok, (BATCH, SEQ_LEN), 0, NUM_WORDS, dtype=jnp.int32)
    params = init_params(k_par)
    prep = prepare_params(params)     # one-time layout/folding prep, outside the jitted forward

    logits = jax.jit(text_classification_forward)(tokens, prep)
    jax.block_until_ready(logits)

    assert logits.shape == (BATCH, NUM_CLASS), logits.shape
    assert logits.dtype == jnp.float32
    print("KERNEL_OK")
</pallas_src>

<mosaic_0001>
module attributes {stable_mosaic.version = 11 : i64} {
  func.func @lstm_head_kernel(%arg0: memref<64x128xi32, #tpu.memory_space<vmem>>, %arg1: memref<128x128xbf16, #tpu.memory_space<vmem>>, %arg2: memref<1x128xf32, #tpu.memory_space<vmem>>, %arg3: memref<32x256xbf16, #tpu.memory_space<vmem>>, %arg4: memref<32x128xbf16, #tpu.memory_space<vmem>>, %arg5: memref<1x128xf32, #tpu.memory_space<vmem>>, %arg6: memref<32x128xbf16, #tpu.memory_space<vmem>>, %arg7: memref<1x128xf32, #tpu.memory_space<vmem>>, %arg8: memref<128x128xbf16, #tpu.memory_space<vmem>>, %arg9: memref<1x128xf32, #tpu.memory_space<vmem>>, %arg10: memref<8x128xf32, #tpu.memory_space<vmem>>) attributes {dimension_semantics = [], scalar_prefetch = 0 : i64, scratch_operands = 0 : i64, tpu.core_type = #tpu.core_type<tc>} {
    %0 = tpu.iota {dimensions = array<i32: 1>} : vector<64x128xi32>
    %c0 = arith.constant 0 : index
    %c0_0 = arith.constant 0 : index
    %1 = vector.load %arg0[%c0, %c0_0] : memref<64x128xi32, #tpu.memory_space<vmem>>, vector<64x128xi32>
    %2 = arith.cmpi eq, %1, %0 : vector<64x128xi32>
    %cst = arith.constant 1.000000e+00 : f32
    %cst_1 = arith.constant 0.000000e+00 : f32
    %3 = vector.broadcast %cst : f32 to vector<64x128xf32>
    %4 = vector.broadcast %cst_1 : f32 to vector<64x128xf32>
    %5 = arith.select %2, %3, %4 : vector<64x128xi1>, vector<64x128xf32>
    %6 = arith.truncf %5 : vector<64x128xf32> to vector<64x128xbf16>
    %c0_2 = arith.constant 0 : index
    %c0_3 = arith.constant 0 : index
    %7 = vector.load %arg1[%c0_2, %c0_3] : memref<128x128xbf16, #tpu.memory_space<vmem>>, vector<128x128xbf16>
    %cst_4 = arith.constant dense<0.000000e+00> : vector<64x128xf32>
    %8 = tpu.matmul %6, %7, %cst_4 {dimension_numbers = #tpu.dot_dimension_numbers<[1], [0], [0], [1], [0, 0, 1, 1], [], []>} : vector<64x128xbf16>, vector<128x128xbf16>, vector<64x128xf32> -> vector<64x128xf32>
    %c0_5 = arith.constant 0 : index
    %c0_6 = arith.constant 0 : index
    %9 = vector.load %arg2[%c0_5, %c0_6] : memref<1x128xf32, #tpu.memory_space<vmem>>, vector<1x128xf32>
    %10 = vector.broadcast %9 : vector<1x128xf32> to vector<64x128xf32>
    %11 = arith.addf %8, %10 : vector<64x128xf32>
    %c0_7 = arith.constant 0 : index
    %c0_8 = arith.constant 0 : index
    %12 = vector.load %arg3[%c0_7, %c0_8] : memref<32x256xbf16, #tpu.memory_space<vmem>>, vector<32x256xbf16>
    %c0_9 = arith.constant 0 : index
    %c0_10 = arith.constant 0 : index
    %13 = vector.load %arg4[%c0_9, %c0_10] : memref<32x128xbf16, #tpu.memory_space<vmem>>, vector<32x128xbf16>
    %c0_11 = arith.constant 0 : index
    %c0_12 = arith.constant 0 : index
    %14 = vector.load %arg5[%c0_11, %c0_12] : memref<1x128xf32, #tpu.memory_space<vmem>>, vector<1x128xf32>
    %cst_13 = arith.constant 0.000000e+00 : f32
    %15 = vector.broadcast %cst_13 : f32 to vector<8x32xf32>
    %cst_14 = arith.constant 0.000000e+00 : f32
    %16 = vector.broadcast %cst_14 : f32 to vector<8x32xf32>
    %17 = vector.extract_strided_slice %11 {offsets = [0, 0], sizes = [8, 128], strides = [1, 1]} : vector<64x128xf32> to vector<8x128xf32>
    %18 = arith.negf %17 : vector<8x128xf32>
    %19 = math.exp %18 : vector<8x128xf32>
    %cst_15 = arith.constant 1.000000e+00 : f32
    %20 = vector.broadcast %cst_15 : f32 to vector<8x128xf32>
    %21 = arith.addf %20, %19 : vector<8x128xf32>
    %22 = arith.divf %20, %21 : vector<8x128xf32>
    %23 = math.tanh %17 : vector<8x128xf32>
    %24 = vector.extract_strided_slice %22 {offsets = [0, 0], sizes = [8, 32], strides = [1, 1]} : vector<8x128xf32> to vector<8x32xf32>
    %25 = vector.extract_strided_slice %22 {offsets = [0, 32], sizes = [8, 32], strides = [1, 1]} : vector<8x128xf32> to vector<8x32xf32>
    %26 = vector.extract_strided_slice %23 {offsets = [0, 64], sizes = [8, 32], strides = [1, 1]} : vector<8x128xf32> to vector<8x32xf32>
    %27 = vector.extract_strided_slice %22 {offsets = [0, 96], sizes = [8, 32], strides = [1, 1]} : vector<8x128xf32> to vector<8x32xf32>
    %28 = arith.mulf %25, %15 : vector<8x32xf32>
    %29 = arith.mulf %24, %26 : vector<8x32xf32>
    %30 = arith.addf %28, %29 : vector<8x32xf32>
    %31 = math.tanh %30 : vector<8x32xf32>
    %32 = arith.mulf %27, %31 : vector<8x32xf32>
    %33 = arith.truncf %32 : vector<8x32xf32> to vector<8x32xbf16>
    %cst_16 = arith.constant dense<0.000000e+00> : vector<8x256xf32>
    %34 = tpu.matmul %33, %12, %cst_16 {dimension_numbers = #tpu.dot_dimension_numbers<[1], [0], [0], [1], [0, 0, 1, 1], [], []>} : vector<8x32xbf16>, vector<32x256xbf16>, vector<8x256xf32> -> vector<8x256xf32>
    %35 = vector.extract_strided_slice %34 {offsets = [0, 0], sizes = [8, 128], strides = [1, 1]} : vector<8x256xf32> to vector<8x128xf32>
    %36 = vector.extract_strided_slice %34 {offsets = [0, 128], sizes = [8, 128], strides = [1, 1]} : vector<8x256xf32> to vector<8x128xf32>
    %37 = vector.broadcast %14 : vector<1x128xf32> to vector<8x128xf32>
    %38 = arith.addf %36, %37 : vector<8x128xf32>
    %39 = arith.negf %38 : vector<8x128xf32>
    %40 = math.exp %39 : vector<8x128xf32>
    %cst_17 = arith.constant 1.000000e+00 : f32
    %41 = vector.broadcast %cst_17 : f32 to vector<8x128xf32>
    %42 = arith.addf %41, %40 : vector<8x128xf32>
    %43 = arith.divf %41, %42 : vector<8x128xf32>
    %44 = math.tanh %38 : vector<8x128xf32>
    %45 = vector.extract_strided_slice %43 {offsets = [0, 0], sizes = [8, 32], strides = [1, 1]} : vector<8x128xf32> to vector<8x32xf32>
    %46 = vector.extract_strided_slice %43 {offsets = [0, 32], sizes = [8, 32], strides = [1, 1]} : vector<8x128xf32> to vector<8x32xf32>
    %47 = vector.extract_strided_slice %44 {offsets = [0, 64], sizes = [8, 32], strides = [1, 1]} : vector<8x128xf32> to vector<8x32xf32>
    %48 = vector.extract_strided_slice %43 {offsets = [0, 96], sizes = [8, 32], strides = [1, 1]} : vector<8x128xf32> to vector<8x32xf32>
    %49 = arith.mulf %46, %16 : vector<8x32xf32>
    %50 = arith.mulf %45, %47 : vector<8x32xf32>
    %51 = arith.addf %49, %50 : vector<8x32xf32>
    %52 = math.tanh %51 : vector<8x32xf32>
    %53 = arith.mulf %48, %52 : vector<8x32xf32>
    %54 = arith.truncf %53 : vector<8x32xf32> to vector<8x32xbf16>
    %55 = vector.extract_strided_slice %11 {offsets = [8, 0], sizes = [8, 128], strides = [1, 1]} : vector<64x128xf32> to vector<8x128xf32>
    %56 = arith.addf %55, %35 : vector<8x128xf32>
    %57 = arith.negf %56 : vector<8x128xf32>
    %58 = math.exp %57 : vector<8x128xf32>
    %cst_18 = arith.constant 1.000000e+00 : f32
    %59 = vector.broadcast %cst_18 : f32 to vector<8x128xf32>
    %60 = arith.addf %59, %58 : vector<8x128xf32>
    %61 = arith.divf %59, %60 : vector<8x128xf32>
    %62 = math.tanh %56 : vector<8x128xf32>
    %63 = vector.extract_strided_slice %61 {offsets = [0, 0], sizes = [8, 32], strides = [1, 1]} : vector<8x128xf32> to vector<8x32xf32>
    %64 = vector.extract_strided_slice %61 {offsets = [0, 32], sizes = [8, 32], strides = [1, 1]} : vector<8x128xf32> to vector<8x32xf32>
    %65 = vector.extract_strided_slice %62 {offsets = [0, 64], sizes = [8, 32], strides = [1, 1]} : vector<8x128xf32> to vector<8x32xf32>
    %66 = vector.extract_strided_slice %61 {offsets = [0, 96], sizes = [8, 32], strides = [1, 1]} : vector<8x128xf32> to vector<8x32xf32>
    %67 = arith.mulf %64, %30 : vector<8x32xf32>
    %68 = arith.mulf %63, %65 : vector<8x32xf32>
    %69 = arith.addf %67, %68 : vector<8x32xf32>
    %70 = math.tanh %69 : vector<8x32xf32>
    %71 = arith.mulf %66, %70 : vector<8x32xf32>
    %72 = arith.truncf %71 : vector<8x32xf32> to vector<8x32xbf16>
    %cst_19 = arith.constant dense<0.000000e+00> : vector<8x256xf32>
    %73 = tpu.matmul %72, %12, %cst_19 {dimension_numbers = #tpu.dot_dimension_numbers<[1], [0], [0], [1], [0, 0, 1, 1], [], []>} : vector<8x32xbf16>, vector<32x256xbf16>, vector<8x256xf32> -> vector<8x256xf32>
    %74 = vector.extract_strided_slice %73 {offsets = [0, 0], sizes = [8, 128], strides = [1, 1]} : vector<8x256xf32> to vector<8x128xf32>
    %75 = vector.extract_strided_slice %73 {offsets = [0, 128], sizes = [8, 128], strides = [1, 1]} : vector<8x256xf32> to vector<8x128xf32>
    %76 = vector.broadcast %14 : vector<1x128xf32> to vector<8x128xf32>
    %77 = arith.addf %75, %76 : vector<8x128xf32>
    %cst_20 = arith.constant dense<0.000000e+00> : vector<8x128xf32>
    %78 = tpu.matmul %54, %13, %cst_20 {dimension_numbers = #tpu.dot_dimension_numbers<[1], [0], [0], [1], [0, 0, 1, 1], [], []>} : vector<8x32xbf16>, vector<32x128xbf16>, vector<8x128xf32> -> vector<8x128xf32>
    %79 = arith.addf %77, %78 : vector<8x128xf32>
    %80 = arith.negf %79 : vector<8x128xf32>
    %81 = math.exp %80 : vector<8x128xf32>
    %cst_21 = arith.constant 1.000000e+00 : f32
    %82 = vector.broadcast %cst_21 : f32 to vector<8x128xf32>
    %83 = arith.addf %82, %81 : vector<8x128xf32>
    %84 = arith.divf %82, %83 : vector<8x128xf32>
    %85 = math.tanh %79 : vector<8x128xf32>
    %86 = vector.extract_strided_slice %84 {offsets = [0, 0], sizes = [8, 32], strides = [1, 1]} : vector<8x128xf32> to vector<8x32xf32>
    %87 = vector.extract_strided_slice %84 {offsets = [0, 32], sizes = [8, 32], strides = [1, 1]} : vector<8x128xf32> to vector<8x32xf32>
    %88 = vector.extract_strided_slice %85 {offsets = [0, 64], sizes = [8, 32], strides = [1, 1]} : vector<8x128xf32> to vector<8x32xf32>
    %89 = vector.extract_strided_slice %84 {offsets = [0, 96], sizes = [8, 32], strides = [1, 1]} : vector<8x128xf32> to vector<8x32xf32>
    %90 = arith.mulf %87, %51 : vector<8x32xf32>
    %91 = arith.mulf %86, %88 : vector<8x32xf32>
    %92 = arith.addf %90, %91 : vector<8x32xf32>
    %93 = math.tanh %92 : vector<8x32xf32>
    %94 = arith.mulf %89, %93 : vector<8x32xf32>
    %95 = arith.truncf %94 : vector<8x32xf32> to vector<8x32xbf16>
    %96 = vector.extract_strided_slice %11 {offsets = [16, 0], sizes = [8, 128], strides = [1, 1]} : vector<64x128xf32> to vector<8x128xf32>
    %97 = arith.addf %96, %74 : vector<8x128xf32>
    %98 = arith.negf %97 : vector<8x128xf32>
    %99 = math.exp %98 : vector<8x128xf32>
    %cst_22 = arith.constant 1.000000e+00 : f32
    %100 = vector.broadcast %cst_22 : f32 to vector<8x128xf32>
    %101 = arith.addf %100, %99 : vector<8x128xf32>
    %102 = arith.divf %100, %101 : vector<8x128xf32>
    %103 = math.tanh %97 : vector<8x128xf32>
    %104 = vector.extract_strided_slice %102 {offsets = [0, 0], sizes = [8, 32], strides = [1, 1]} : vector<8x128xf32> to vector<8x32xf32>
    %105 = vector.extract_strided_slice %102 {offsets = [0, 32], sizes = [8, 32], strides = [1, 1]} : vector<8x128xf32> to vector<8x32xf32>
    %106 = vector.extract_strided_slice %103 {offsets = [0, 64], sizes = [8, 32], strides = [1, 1]} : vector<8x128xf32> to vector<8x32xf32>
    %107 = vector.extract_strided_slice %102 {offsets = [0, 96], sizes = [8, 32], strides = [1, 1]} : vector<8x128xf32> to vector<8x32xf32>
    %108 = arith.mulf %105, %69 : vector<8x32xf32>
    %109 = arith.mulf %104, %106 : vector<8x32xf32>
    %110 = arith.addf %108, %109 : vector<8x32xf32>
    %111 = math.tanh %110 : vector<8x32xf32>
    %112 = arith.mulf %107, %111 : vector<8x32xf32>
    %113 = arith.truncf %112 : vector<8x32xf32> to vector<8x32xbf16>
    %cst_23 = arith.constant dense<0.000000e+00> : vector<8x256xf32>
    %114 = tpu.matmul %113, %12, %cst_23 {dimension_numbers = #tpu.dot_dimension_numbers<[1], [0], [0], [1], [0, 0, 1, 1], [], []>} : vector<8x32xbf16>, vector<32x256xbf16>, vector<8x256xf32> -> vector<8x256xf32>
    %115 = vector.extract_strided_slice %114 {offsets = [0, 0], sizes = [8, 128], strides = [1, 1]} : vector<8x256xf32> to vector<8x128xf32>
    %116 = vector.extract_strided_slice %114 {offsets = [0, 128], sizes = [8, 128], strides = [1, 1]} : vector<8x256xf32> to vector<8x128xf32>
    %117 = vector.broadcast %14 : vector<1x128xf32> to vector<8x128xf32>
    %118 = arith.addf %116, %117 : vector<8x128xf32>
    %cst_24 = arith.constant dense<0.000000e+00> : vector<8x128xf32>
    %119 = tpu.matmul %95, %13, %cst_24 {dimension_numbers = #tpu.dot_dimension_numbers<[1], [0], [0], [1], [0, 0, 1, 1], [], []>} : vector<8x32xbf16>, vector<32x128xbf16>, vector<8x128xf32> -> vector<8x128xf32>
    %120 = arith.addf %118, %119 : vector<8x128xf32>
    %121 = arith.negf %120 : vector<8x128xf32>
    %122 = math.exp %121 : vector<8x128xf32>
    %cst_25 = arith.constant 1.000000e+00 : f32
    %123 = vector.broadcast %cst_25 : f32 to vector<8x128xf32>
    %124 = arith.addf %123, %122 : vector<8x128xf32>
    %125 = arith.divf %123, %124 : vector<8x128xf32>
    %126 = math.tanh %120 : vector<8x128xf32>
    %127 = vector.extract_strided_slice %125 {offsets = [0, 0], sizes = [8, 32], strides = [1, 1]} : vector<8x128xf32> to vector<8x32xf32>
    %128 = vector.extract_strided_slice %125 {offsets = [0, 32], sizes = [8, 32], strides = [1, 1]} : vector<8x128xf32> to vector<8x32xf32>
    %129 = vector.extract_strided_slice %126 {offsets = [0, 64], sizes = [8, 32], strides = [1, 1]} : vector<8x128xf32> to vector<8x32xf32>
    %130 = vector.extract_strided_slice %125 {offsets = [0, 96], sizes = [8, 32], strides = [1, 1]} : vector<8x128xf32> to vector<8x32xf32>
    %131 = arith.mulf %128, %92 : vector<8x32xf32>
    %132 = arith.mulf %127, %129 : vector<8x32xf32>
    %133 = arith.addf %131, %132 : vector<8x32xf32>
    %134 = math.tanh %133 : vector<8x32xf32>
    %135 = arith.mulf %130, %134 : vector<8x32xf32>
    %136 = arith.truncf %135 : vector<8x32xf32> to vector<8x32xbf16>
    %137 = vector.extract_strided_slice %11 {offsets = [24, 0], sizes = [8, 128], strides = [1, 1]} : vector<64x128xf32> to vector<8x128xf32>
    %138 = arith.addf %137, %115 : vector<8x128xf32>
    %139 = arith.negf %138 : vector<8x128xf32>
    %140 = math.exp %139 : vector<8x128xf32>
    %cst_26 = arith.constant 1.000000e+00 : f32
    %141 = vector.broadcast %cst_26 : f32 to vector<8x128xf32>
    %142 = arith.addf %141, %140 : vector<8x128xf32>
    %143 = arith.divf %141, %142 : vector<8x128xf32>
    %144 = math.tanh %138 : vector<8x128xf32>
    %145 = vector.extract_strided_slice %143 {offsets = [0, 0], sizes = [8, 32], strides = [1, 1]} : vector<8x128xf32> to vector<8x32xf32>
    %146 = vector.extract_strided_slice %143 {offsets = [0, 32], sizes = [8, 32], strides = [1, 1]} : vector<8x128xf32> to vector<8x32xf32>
    %147 = vector.extract_strided_slice %144 {offsets = [0, 64], sizes = [8, 32], strides = [1, 1]} : vector<8x128xf32> to vector<8x32xf32>
    %148 = vector.extract_strided_slice %143 {offsets = [0, 96], sizes = [8, 32], strides = [1, 1]} : vector<8x128xf32> to vector<8x32xf32>
    %149 = arith.mulf %146, %110 : vector<8x32xf32>
    %150 = arith.mulf %145, %147 : vector<8x32xf32>
    %151 = arith.addf %149, %150 : vector<8x32xf32>
    %152 = math.tanh %151 : vector<8x32xf32>
    %153 = arith.mulf %148, %152 : vector<8x32xf32>
    %154 = arith.truncf %153 : vector<8x32xf32> to vector<8x32xbf16>
    %cst_27 = arith.constant dense<0.000000e+00> : vector<8x256xf32>
    %155 = tpu.matmul %154, %12, %cst_27 {dimension_numbers = #tpu.dot_dimension_numbers<[1], [0], [0], [1], [0, 0, 1, 1], [], []>} : vector<8x32xbf16>, vector<32x256xbf16>, vector<8x256xf32> -> vector<8x256xf32>
    %156 = vector.extract_strided_slice %155 {offsets = [0, 0], sizes = [8, 128], strides = [1, 1]} : vector<8x256xf32> to vector<8x128xf32>
    %157 = vector.extract_strided_slice %155 {offsets = [0, 128], sizes = [8, 128], strides = [1, 1]} : vector<8x256xf32> to vector<8x128xf32>
    %158 = vector.broadcast %14 : vector<1x128xf32> to vector<8x128xf32>
    %159 = arith.addf %157, %158 : vector<8x128xf32>
    %cst_28 = arith.constant dense<0.000000e+00> : vector<8x128xf32>
    %160 = tpu.matmul %136, %13, %cst_28 {dimension_numbers = #tpu.dot_dimension_numbers<[1], [0], [0], [1], [0, 0, 1, 1], [], []>} : vector<8x32xbf16>, vector<32x128xbf16>, vector<8x128xf32> -> vector<8x128xf32>
    %161 = arith.addf %159, %160 : vector<8x128xf32>
    %162 = arith.negf %161 : vector<8x128xf32>
    %163 = math.exp %162 : vector<8x128xf32>
    %cst_29 = arith.constant 1.000000e+00 : f32
    %164 = vector.broadcast %cst_29 : f32 to vector<8x128xf32>
    %165 = arith.addf %164, %163 : vector<8x128xf32>
    %166 = arith.divf %164, %165 : vector<8x128xf32>
    %167 = math.tanh %161 : vector<8x128xf32>
    %168 = vector.extract_strided_slice %166 {offsets = [0, 0], sizes = [8, 32], strides = [1, 1]} : vector<8x128xf32> to vector<8x32xf32>
    %169 = vector.extract_strided_slice %166 {offsets = [0, 32], sizes = [8, 32], strides = [1, 1]} : vector<8x128xf32> to vector<8x32xf32>
    %170 = vector.extract_strided_slice %167 {offsets = [0, 64], sizes = [8, 32], strides = [1, 1]} : vector<8x128xf32> to vector<8x32xf32>
    %171 = vector.extract_strided_slice %166 {offsets = [0, 96], sizes = [8, 32], strides = [1, 1]} : vector<8x128xf32> to vector<8x32xf32>
    %172 = arith.mulf %169, %133 : vector<8x32xf32>
    %173 = arith.mulf %168, %170 : vector<8x32xf32>
    %174 = arith.addf %172, %173 : vector<8x32xf32>
    %175 = math.tanh %174 : vector<8x32xf32>
    %176 = arith.mulf %171, %175 : vector<8x32xf32>
    %177 = arith.truncf %176 : vector<8x32xf32> to vector<8x32xbf16>
    %178 = vector.extract_strided_slice %11 {offsets = [32, 0], sizes = [8, 128], strides = [1, 1]} : vector<64x128xf32> to vector<8x128xf32>
    %179 = arith.addf %178, %156 : vector<8x128xf32>
    %180 = arith.negf %179 : vector<8x128xf32>
    %181 = math.exp %180 : vector<8x128xf32>
    %cst_30 = arith.constant 1.000000e+00 : f32
    %182 = vector.broadcast %cst_30 : f32 to vector<8x128xf32>
    %183 = arith.addf %182, %181 : vector<8x128xf32>
    %184 = arith.divf %182, %183 : vector<8x128xf32>
    %185 = math.tanh %179 : vector<8x128xf32>
    %186 = vector.extract_strided_slice %184 {offsets = [0, 0], sizes = [8, 32], strides = [1, 1]} : vector<8x128xf32> to vector<8x32xf32>
    %187 = vector.extract_strided_slice %184 {offsets = [0, 32], sizes = [8, 32], strides = [1, 1]} : vector<8x128xf32> to vector<8x32xf32>
    %188 = vector.extract_strided_slice %185 {offsets = [0, 64], sizes = [8, 32], strides = [1, 1]} : vector<8x128xf32> to vector<8x32xf32>
    %189 = vector.extract_strided_slice %184 {offsets = [0, 96], sizes = [8, 32], strides = [1, 1]} : vector<8x128xf32> to vector<8x32xf32>
    %190 = arith.mulf %187, %151 : vector<8x32xf32>
    %191 = arith.mulf %186, %188 : vector<8x32xf32>
    %192 = arith.addf %190, %191 : vector<8x32xf32>
    %193 = math.tanh %192 : vector<8x32xf32>
    %194 = arith.mulf %189, %193 : vector<8x32xf32>
    %195 = arith.truncf %194 : vector<8x32xf32> to vector<8x32xbf16>
    %cst_31 = arith.constant dense<0.000000e+00> : vector<8x256xf32>
    %196 = tpu.matmul %195, %12, %cst_31 {dimension_numbers = #tpu.dot_dimension_numbers<[1], [0], [0], [1], [0, 0, 1, 1], [], []>} : vector<8x32xbf16>, vector<32x256xbf16>, vector<8x256xf32> -> vector<8x256xf32>
    %197 = vector.extract_strided_slice %196 {offsets = [0, 0], sizes = [8, 128], strides = [1, 1]} : vector<8x256xf32> to vector<8x128xf32>
    %198 = vector.extract_strided_slice %196 {offsets = [0, 128], sizes = [8, 128], strides = [1, 1]} : vector<8x256xf32> to vector<8x128xf32>
    %199 = vector.broadcast %14 : vector<1x128xf32> to vector<8x128xf32>
    %200 = arith.addf %198, %199 : vector<8x128xf32>
    %cst_32 = arith.constant dense<0.000000e+00> : vector<8x128xf32>
    %201 = tpu.matmul %177, %13, %cst_32 {dimension_numbers = #tpu.dot_dimension_numbers<[1], [0], [0], [1], [0, 0, 1, 1], [], []>} : vector<8x32xbf16>, vector<32x128xbf16>, vector<8x128xf32> -> vector<8x128xf32>
    %202 = arith.addf %200, %201 : vector<8x128xf32>
    %203 = arith.negf %202 : vector<8x128xf32>
    %204 = math.exp %203 : vector<8x128xf32>
    %cst_33 = arith.constant 1.000000e+00 : f32
    %205 = vector.broadcast %cst_33 : f32 to vector<8x128xf32>
    %206 = arith.addf %205, %204 : vector<8x128xf32>
    %207 = arith.divf %205, %206 : vector<8x128xf32>
    %208 = math.tanh %202 : vector<8x128xf32>
    %209 = vector.extract_strided_slice %207 {offsets = [0, 0], sizes = [8, 32], strides = [1, 1]} : vector<8x128xf32> to vector<8x32xf32>
    %210 = vector.extract_strided_slice %207 {offsets = [0, 32], sizes = [8, 32], strides = [1, 1]} : vector<8x128xf32> to vector<8x32xf32>
    %211 = vector.extract_strided_slice %208 {offsets = [0, 64], sizes = [8, 32], strides = [1, 1]} : vector<8x128xf32> to vector<8x32xf32>
    %212 = vector.extract_strided_slice %207 {offsets = [0, 96], sizes = [8, 32], strides = [1, 1]} : vector<8x128xf32> to vector<8x32xf32>
    %213 = arith.mulf %210, %174 : vector<8x32xf32>
    %214 = arith.mulf %209, %211 : vector<8x32xf32>
    %215 = arith.addf %213, %214 : vector<8x32xf32>
    %216 = math.tanh %215 : vector<8x32xf32>
    %217 = arith.mulf %212, %216 : vector<8x32xf32>
    %218 = arith.truncf %217 : vector<8x32xf32> to vector<8x32xbf16>
    %219 = vector.extract_strided_slice %11 {offsets = [40, 0], sizes = [8, 128], strides = [1, 1]} : vector<64x128xf32> to vector<8x128xf32>
    %220 = arith.addf %219, %197 : vector<8x128xf32>
    %221 = arith.negf %220 : vector<8x128xf32>
    %222 = math.exp %221 : vector<8x128xf32>
    %cst_34 = arith.constant 1.000000e+00 : f32
    %223 = vector.broadcast %cst_34 : f32 to vector<8x128xf32>
    %224 = arith.addf %223, %222 : vector<8x128xf32>
    %225 = arith.divf %223, %224 : vector<8x128xf32>
    %226 = math.tanh %220 : vector<8x128xf32>
    %227 = vector.extract_strided_slice %225 {offsets = [0, 0], sizes = [8, 32], strides = [1, 1]} : vector<8x128xf32> to vector<8x32xf32>
    %228 = vector.extract_strided_slice %225 {offsets = [0, 32], sizes = [8, 32], strides = [1, 1]} : vector<8x128xf32> to vector<8x32xf32>
    %229 = vector.extract_strided_slice %226 {offsets = [0, 64], sizes = [8, 32], strides = [1, 1]} : vector<8x128xf32> to vector<8x32xf32>
    %230 = vector.extract_strided_slice %225 {offsets = [0, 96], sizes = [8, 32], strides = [1, 1]} : vector<8x128xf32> to vector<8x32xf32>
    %231 = arith.mulf %228, %192 : vector<8x32xf32>
    %232 = arith.mulf %227, %229 : vector<8x32xf32>
    %233 = arith.addf %231, %232 : vector<8x32xf32>
    %234 = math.tanh %233 : vector<8x32xf32>
    %235 = arith.mulf %230, %234 : vector<8x32xf32>
    %236 = arith.truncf %235 : vector<8x32xf32> to vector<8x32xbf16>
    %cst_35 = arith.constant dense<0.000000e+00> : vector<8x256xf32>
    %237 = tpu.matmul %236, %12, %cst_35 {dimension_numbers = #tpu.dot_dimension_numbers<[1], [0], [0], [1], [0, 0, 1, 1], [], []>} : vector<8x32xbf16>, vector<32x256xbf16>, vector<8x256xf32> -> vector<8x256xf32>
    %238 = vector.extract_strided_slice %237 {offsets = [0, 0], sizes = [8, 128], strides = [1, 1]} : vector<8x256xf32> to vector<8x128xf32>
    %239 = vector.extract_strided_slice %237 {offsets = [0, 128], sizes = [8, 128], strides = [1, 1]} : vector<8x256xf32> to vector<8x128xf32>
    %240 = vector.broadcast %14 : vector<1x128xf32> to vector<8x128xf32>
    %241 = arith.addf %239, %240 : vector<8x128xf32>
    %cst_36 = arith.constant dense<0.000000e+00> : vector<8x128xf32>
    %242 = tpu.matmul %218, %13, %cst_36 {dimension_numbers = #tpu.dot_dimension_numbers<[1], [0], [0], [1], [0, 0, 1, 1], [], []>} : vector<8x32xbf16>, vector<32x128xbf16>, vector<8x128xf32> -> vector<8x128xf32>
    %243 = arith.addf %241, %242 : vector<8x128xf32>
    %244 = arith.negf %243 : vector<8x128xf32>
    %245 = math.exp %244 : vector<8x128xf32>
    %cst_37 = arith.constant 1.000000e+00 : f32
    %246 = vector.broadcast %cst_37 : f32 to vector<8x128xf32>
    %247 = arith.addf %246, %245 : vector<8x128xf32>
    %248 = arith.divf %246, %247 : vector<8x128xf32>
    %249 = math.tanh %243 : vector<8x128xf32>
    %250 = vector.extract_strided_slice %248 {offsets = [0, 0], sizes = [8, 32], strides = [1, 1]} : vector<8x128xf32> to vector<8x32xf32>
    %251 = vector.extract_strided_slice %248 {offsets = [0, 32], sizes = [8, 32], strides = [1, 1]} : vector<8x128xf32> to vector<8x32xf32>
    %252 = vector.extract_strided_slice %249 {offsets = [0, 64], sizes = [8, 32], strides = [1, 1]} : vector<8x128xf32> to vector<8x32xf32>
    %253 = vector.extract_strided_slice %248 {offsets = [0, 96], sizes = [8, 32], strides = [1, 1]} : vector<8x128xf32> to vector<8x32xf32>
    %254 = arith.mulf %251, %215 : vector<8x32xf32>
    %255 = arith.mulf %250, %252 : vector<8x32xf32>
    %256 = arith.addf %254, %255 : vector<8x32xf32>
    %257 = math.tanh %256 : vector<8x32xf32>
    %258 = arith.mulf %253, %257 : vector<8x32xf32>
    %259 = arith.truncf %258 : vector<8x32xf32> to vector<8x32xbf16>
    %260 = vector.extract_strided_slice %11 {offsets = [48, 0], sizes = [8, 128], strides = [1, 1]} : vector<64x128xf32> to vector<8x128xf32>
    %261 = arith.addf %260, %238 : vector<8x128xf32>
    %262 = arith.negf %261 : vector<8x128xf32>
    %263 = math.exp %262 : vector<8x128xf32>
    %cst_38 = arith.constant 1.000000e+00 : f32
    %264 = vector.broadcast %cst_38 : f32 to vector<8x128xf32>
    %265 = arith.addf %264, %263 : vector<8x128xf32>
    %266 = arith.divf %264, %265 : vector<8x128xf32>
    %267 = math.tanh %261 : vector<8x128xf32>
    %268 = vector.extract_strided_slice %266 {offsets = [0, 0], sizes = [8, 32], strides = [1, 1]} : vector<8x128xf32> to vector<8x32xf32>
    %269 = vector.extract_strided_slice %266 {offsets = [0, 32], sizes = [8, 32], strides = [1, 1]} : vector<8x128xf32> to vector<8x32xf32>
    %270 = vector.extract_strided_slice %267 {offsets = [0, 64], sizes = [8, 32], strides = [1, 1]} : vector<8x128xf32> to vector<8x32xf32>
    %271 = vector.extract_strided_slice %266 {offsets = [0, 96], sizes = [8, 32], strides = [1, 1]} : vector<8x128xf32> to vector<8x32xf32>
    %272 = arith.mulf %269, %233 : vector<8x32xf32>
    %273 = arith.mulf %268, %270 : vector<8x32xf32>
    %274 = arith.addf %272, %273 : vector<8x32xf32>
    %275 = math.tanh %274 : vector<8x32xf32>
    %276 = arith.mulf %271, %275 : vector<8x32xf32>
    %277 = arith.truncf %276 : vector<8x32xf32> to vector<8x32xbf16>
    %cst_39 = arith.constant dense<0.000000e+00> : vector<8x256xf32>
    %278 = tpu.matmul %277, %12, %cst_39 {dimension_numbers = #tpu.dot_dimension_numbers<[1], [0], [0], [1], [0, 0, 1, 1], [], []>} : vector<8x32xbf16>, vector<32x256xbf16>, vector<8x256xf32> -> vector<8x256xf32>
    %279 = vector.extract_strided_slice %278 {offsets = [0, 0], sizes = [8, 128], strides = [1, 1]} : vector<8x256xf32> to vector<8x128xf32>
    %280 = vector.extract_strided_slice %278 {offsets = [0, 128], sizes = [8, 128], strides = [1, 1]} : vector<8x256xf32> to vector<8x128xf32>
    %281 = vector.broadcast %14 : vector<1x128xf32> to vector<8x128xf32>
    %282 = arith.addf %280, %281 : vector<8x128xf32>
    %cst_40 = arith.constant dense<0.000000e+00> : vector<8x128xf32>
    %283 = tpu.matmul %259, %13, %cst_40 {dimension_numbers = #tpu.dot_dimension_numbers<[1], [0], [0], [1], [0, 0, 1, 1], [], []>} : vector<8x32xbf16>, vector<32x128xbf16>, vector<8x128xf32> -> vector<8x128xf32>
    %284 = arith.addf %282, %283 : vector<8x128xf32>
    %285 = arith.negf %284 : vector<8x128xf32>
    %286 = math.exp %285 : vector<8x128xf32>
    %cst_41 = arith.constant 1.000000e+00 : f32
    %287 = vector.broadcast %cst_41 : f32 to vector<8x128xf32>
    %288 = arith.addf %287, %286 : vector<8x128xf32>
    %289 = arith.divf %287, %288 : vector<8x128xf32>
    %290 = math.tanh %284 : vector<8x128xf32>
    %291 = vector.extract_strided_slice %289 {offsets = [0, 0], sizes = [8, 32], strides = [1, 1]} : vector<8x128xf32> to vector<8x32xf32>
    %292 = vector.extract_strided_slice %289 {offsets = [0, 32], sizes = [8, 32], strides = [1, 1]} : vector<8x128xf32> to vector<8x32xf32>
    %293 = vector.extract_strided_slice %290 {offsets = [0, 64], sizes = [8, 32], strides = [1, 1]} : vector<8x128xf32> to vector<8x32xf32>
    %294 = vector.extract_strided_slice %289 {offsets = [0, 96], sizes = [8, 32], strides = [1, 1]} : vector<8x128xf32> to vector<8x32xf32>
    %295 = arith.mulf %292, %256 : vector<8x32xf32>
    %296 = arith.mulf %291, %293 : vector<8x32xf32>
    %297 = arith.addf %295, %296 : vector<8x32xf32>
    %298 = math.tanh %297 : vector<8x32xf32>
    %299 = arith.mulf %294, %298 : vector<8x32xf32>
    %300 = arith.truncf %299 : vector<8x32xf32> to vector<8x32xbf16>
    %301 = vector.extract_strided_slice %11 {offsets = [56, 0], sizes = [8, 128], strides = [1, 1]} : vector<64x128xf32> to vector<8x128xf32>
    %302 = arith.addf %301, %279 : vector<8x128xf32>
    %303 = arith.negf %302 : vector<8x128xf32>
    %304 = math.exp %303 : vector<8x128xf32>
    %cst_42 = arith.constant 1.000000e+00 : f32
    %305 = vector.broadcast %cst_42 : f32 to vector<8x128xf32>
    %306 = arith.addf %305, %304 : vector<8x128xf32>
    %307 = arith.divf %305, %306 : vector<8x128xf32>
    %308 = math.tanh %302 : vector<8x128xf32>
    %309 = vector.extract_strided_slice %307 {offsets = [0, 0], sizes = [8, 32], strides = [1, 1]} : vector<8x128xf32> to vector<8x32xf32>
    %310 = vector.extract_strided_slice %307 {offsets = [0, 32], sizes = [8, 32], strides = [1, 1]} : vector<8x128xf32> to vector<8x32xf32>
    %311 = vector.extract_strided_slice %308 {offsets = [0, 64], sizes = [8, 32], strides = [1, 1]} : vector<8x128xf32> to vector<8x32xf32>
    %312 = vector.extract_strided_slice %307 {offsets = [0, 96], sizes = [8, 32], strides = [1, 1]} : vector<8x128xf32> to vector<8x32xf32>
    %313 = arith.mulf %310, %274 : vector<8x32xf32>
    %314 = arith.mulf %309, %311 : vector<8x32xf32>
    %315 = arith.addf %313, %314 : vector<8x32xf32>
    %316 = math.tanh %315 : vector<8x32xf32>
    %317 = arith.mulf %312, %316 : vector<8x32xf32>
    %318 = arith.truncf %317 : vector<8x32xf32> to vector<8x32xbf16>
    %cst_43 = arith.constant dense<0.000000e+00> : vector<8x256xf32>
    %319 = tpu.matmul %318, %12, %cst_43 {dimension_numbers = #tpu.dot_dimension_numbers<[1], [0], [0], [1], [0, 0, 1, 1], [], []>} : vector<8x32xbf16>, vector<32x256xbf16>, vector<8x256xf32> -> vector<8x256xf32>
    %320 = vector.extract_strided_slice %319 {offsets = [0, 128], sizes = [8, 128], strides = [1, 1]} : vector<8x256xf32> to vector<8x128xf32>
    %321 = vector.broadcast %14 : vector<1x128xf32> to vector<8x128xf32>
    %322 = arith.addf %320, %321 : vector<8x128xf32>
    %cst_44 = arith.constant dense<0.000000e+00> : vector<8x128xf32>
    %323 = tpu.matmul %300, %13, %cst_44 {dimension_numbers = #tpu.dot_dimension_numbers<[1], [0], [0], [1], [0, 0, 1, 1], [], []>} : vector<8x32xbf16>, vector<32x128xbf16>, vector<8x128xf32> -> vector<8x128xf32>
    %324 = arith.addf %322, %323 : vector<8x128xf32>
    %325 = arith.negf %324 : vector<8x128xf32>
    %326 = math.exp %325 : vector<8x128xf32>
    %cst_45 = arith.constant 1.000000e+00 : f32
    %327 = vector.broadcast %cst_45 : f32 to vector<8x128xf32>
    %328 = arith.addf %327, %326 : vector<8x128xf32>
    %329 = arith.divf %327, %328 : vector<8x128xf32>
    %330 = math.tanh %324 : vector<8x128xf32>
    %331 = vector.extract_strided_slice %329 {offsets = [0, 0], sizes = [8, 32], strides = [1, 1]} : vector<8x128xf32> to vector<8x32xf32>
    %332 = vector.extract_strided_slice %329 {offsets = [0, 32], sizes = [8, 32], strides = [1, 1]} : vector<8x128xf32> to vector<8x32xf32>
    %333 = vector.extract_strided_slice %330 {offsets = [0, 64], sizes = [8, 32], strides = [1, 1]} : vector<8x128xf32> to vector<8x32xf32>
    %334 = vector.extract_strided_slice %329 {offsets = [0, 96], sizes = [8, 32], strides = [1, 1]} : vector<8x128xf32> to vector<8x32xf32>
    %335 = arith.mulf %332, %297 : vector<8x32xf32>
    %336 = arith.mulf %331, %333 : vector<8x32xf32>
    %337 = arith.addf %335, %336 : vector<8x32xf32>
    %338 = math.tanh %337 : vector<8x32xf32>
    %339 = arith.mulf %334, %338 : vector<8x32xf32>
    %340 = arith.truncf %339 : vector<8x32xf32> to vector<8x32xbf16>
    %c0_46 = arith.constant 0 : index
    %c0_47 = arith.constant 0 : index
    %341 = vector.load %arg6[%c0_46, %c0_47] : memref<32x128xbf16, #tpu.memory_space<vmem>>, vector<32x128xbf16>
    %cst_48 = arith.constant dense<0.000000e+00> : vector<8x128xf32>
    %342 = tpu.matmul %340, %341, %cst_48 {dimension_numbers = #tpu.dot_dimension_numbers<[1], [0], [0], [1], [0, 0, 1, 1], [], []>} : vector<8x32xbf16>, vector<32x128xbf16>, vector<8x128xf32> -> vector<8x128xf32>
    %c0_49 = arith.constant 0 : index
    %c0_50 = arith.constant 0 : index
    %343 = vector.load %arg7[%c0_49, %c0_50] : memref<1x128xf32, #tpu.memory_space<vmem>>, vector<1x128xf32>
    %344 = vector.broadcast %343 : vector<1x128xf32> to vector<8x128xf32>
    %345 = arith.addf %342, %344 : vector<8x128xf32>
    %cst_51 = arith.constant 0.000000e+00 : f32
    %346 = vector.broadcast %cst_51 : f32 to vector<8x128xf32>
    %347 = arith.maximumf %345, %346 : vector<8x128xf32>
    %348 = arith.truncf %347 : vector<8x128xf32> to vector<8x128xbf16>
    %c0_52 = arith.constant 0 : index
    %c0_53 = arith.constant 0 : index
    %349 = vector.load %arg8[%c0_52, %c0_53] : memref<128x128xbf16, #tpu.memory_space<vmem>>, vector<128x128xbf16>
    %cst_54 = arith.constant dense<0.000000e+00> : vector<8x128xf32>
    %350 = tpu.matmul %348, %349, %cst_54 {dimension_numbers = #tpu.dot_dimension_numbers<[1], [0], [0], [1], [0, 0, 1, 1], [], []>} : vector<8x128xbf16>, vector<128x128xbf16>, vector<8x128xf32> -> vector<8x128xf32>
    %c0_55 = arith.constant 0 : index
    %c0_56 = arith.constant 0 : index
    %351 = vector.load %arg9[%c0_55, %c0_56] : memref<1x128xf32, #tpu.memory_space<vmem>>, vector<1x128xf32>
    %352 = vector.broadcast %351 : vector<1x128xf32> to vector<8x128xf32>
    %353 = arith.addf %350, %352 : vector<8x128xf32>
    %c0_57 = arith.constant 0 : index
    %c0_58 = arith.constant 0 : index
    %354 = vector.load %arg10[%c0_57, %c0_58] : memref<8x128xf32, #tpu.memory_space<vmem>>, vector<8x128xf32>
    tpu.vector_store %arg10[%c0_57, %c0_58], %353 {strides = array<i32>} : memref<8x128xf32, #tpu.memory_space<vmem>>, vector<8x128xf32>,
    return
  }
}

</mosaic_0001>

<bundles_post_ra>
// kernel: text_classification_forward.1
= control target key start
LH: loop header
LB: loop body
LE: loop exit
PB: predicated region body
PF: predicated region fallthrough
CT: control target
= control target key end

     0   :  { %15 = vsyncpa [#allocation3], 0  ;;  %s2601_s0 = inlined_call_operand.vmem [shape: s32[64,128], index: 0, kind: input, shape index: {}]   ;;  %s2602_s1 = inlined_call_operand.vmem [shape: bf16[128,128], index: 1, kind: input, shape index: {}]   ;;  %s2603_s2 = inlined_call_operand.hbm [shape: f32[1,128], index: 2, kind: input, shape index: {}]   ;;  %s2604_s3 = inlined_call_operand.vmem [shape: bf16[32,256], index: 3, kind: input, shape index: {}]   ;;  %s2605_s4 = inlined_call_operand.vmem [shape: bf16[32,128], index: 4, kind: input, shape index: {}]   ;;  %s2606_s5 = inlined_call_operand.hbm [shape: f32[1,128], index: 5, kind: input, shape index: {}]   ;;  %s2607_s6 = inlined_call_operand.hbm [shape: bf16[32,128], index: 6, kind: input, shape index: {}]   ;;  %s2608_s7 = inlined_call_operand.hbm [shape: f32[1,128], index: 7, kind: input, shape index: {}]   ;;  %s2609_s8 = inlined_call_operand.hbm [shape: bf16[128,128], index: 8, kind: input, shape index: {}]   ;;  %s2610_s9 = inlined_call_operand.hbm [shape: f32[1,128], index: 9, kind: input, shape index: {}]   ;;  %s2611_s10 = inlined_call_operand.vmem [shape: f32[8,128], index: 10, kind: output, shape index: {}]  }
   0x1   :  { %16 = vsyncpa [#allocation5], 0 }
   0x2   :  { %17 = vsyncpa [#allocation8], 0 }
   0x3   :  { %18 = vsyncpa [#allocation11], 0  ;;  %s2150_s13 = smov [#allocation4]   ;;  %s2151_s15 = smov [#allocation7]  }
   0x4   :  { %s43_s14 = sshll.u32 %s2150_s13, 4  ;;  %s65_s16 = sshll.u32 %s2151_s15, 4  ;;  %s44_s14 = int_to_ptr.vmem [resolvable:$true] %s43_s14  ;;  %s66_s16 = int_to_ptr.vmem [resolvable:$true] %s65_s16 }
   0x5   :  { %s2030_s17 = scalar_lea.vmem %s44_s14, 16  ;;  %s2034_s18 = scalar_lea.vmem %s44_s14, 32 }
   0x6   :  { %p2031_p0 = scmp.ne.s32.totalorder %s44_s14, %s2030_s17  ;;  %p2035_p1 = scmp.lt.s32.totalorder %s44_s14, %s44_s14 }
   0x7   :  { %p2036_p2 = scmp.lt.s32.totalorder %s2034_s18, %s2030_s17 }
   0x9   :  { %p2037_p3 = por %p2036_p2, %p2035_p1 }
   0xb   :  { %p2038_p4 = pnand %p2037_p3, %p2031_p0 }
   0xd   :  { %2041 = shalt.err (!%p2038_p4)
}
   0xe   :  { %46 = dma.hbm_to_vmem [thread:$0]  %s2606_s5, 16, %s44_s14, [#allocation5]  }
   0xf   :  { %s2050_s21 = scalar_lea.vmem %s66_s16, 16  ;;  %s2054_s22 = scalar_lea.vmem %s66_s16, 32 }
  0x10   :  { %p2051_p5 = scmp.ne.s32.totalorder %s66_s16, %s2050_s21  ;;  %p2055_p6 = scmp.lt.s32.totalorder %s66_s16, %s66_s16 }
  0x11   :  { %p2056_p7 = scmp.lt.s32.totalorder %s2054_s22, %s2050_s21 }
  0x13   :  { %p2057_p8 = por %p2056_p7, %p2055_p6 }
  0x15   :  { %p2058_p9 = pnand %p2057_p8, %p2051_p5 }
  0x17   :  { %2061 = shalt.err (!%p2058_p9)
}
  0x18   :  { %68 = dma.hbm_to_vmem [thread:$0]  %s2608_s7, 16, %s66_s16, [#allocation8]  }
  0x19   :  { %s2152_s25 = smov [#allocation2]   ;;  %s2153_s27 = smov [#allocation6]  }
  0x1a   :  { %s29_s26 = sshll.u32 %s2152_s25, 4  ;;  %s52_s28 = sshll.u32 %s2153_s27, 4  ;;  %s30_s26 = int_to_ptr.vmem [resolvable:$true] %s29_s26  ;;  %s53_s28 = int_to_ptr.vmem [resolvable:$true] %s52_s28 }
  0x1b   :  { %s2070_s29 = scalar_lea.vmem %s30_s26, 16  ;;  %s2074_s5 = scalar_lea.vmem %s30_s26, 32 }
  0x1c   :  { %p2071_p10 = scmp.ne.s32.totalorder %s30_s26, %s2070_s29  ;;  %p2075_p11 = scmp.lt.s32.totalorder %s30_s26, %s30_s26 }
  0x1d   :  { %p2076_p12 = scmp.lt.s32.totalorder %s2074_s5, %s2070_s29 }
  0x1f   :  { %p2077_p13 = por %p2076_p12, %p2075_p11 }
  0x21   :  { %p2078_p0 = pnand %p2077_p13, %p2071_p10 }
  0x23   :  { %2081 = shalt.err (!%p2078_p0)
}
  0x24   :  { %32 = dma.hbm_to_vmem [thread:$0]  %s2603_s2, 16, %s30_s26, [#allocation3]  }
  0x25   :  { %s2090_s12 = scalar_lea.vmem %s53_s28, 256  ;;  %p2095_p2 = scmp.lt.s32.totalorder %s53_s28, %s53_s28 }
  0x26   :  { %p2091_p1 = scmp.ne.s32.totalorder %s53_s28, %s2090_s12  ;;  %p2096_p3 = scmp.lt.s32.totalorder %s2090_s12, %s2090_s12 }
  0x28   :  { %p2097_p4 = por %p2096_p3, %p2095_p2 }
  0x2a   :  { %p2098_p5 = pnand %p2097_p4, %p2091_p1 }
  0x2c   :  { %2101 = shalt.err (!%p2098_p5)
}
  0x2d   :  { %s2154_s7 = smov 64   ;;  %s2155_s13 = smov 4  }
  0x2e   :  { %58 = dma.hbm_to_vmem [thread:$0]  %s2607_s6, 256, %s53_s28, [#allocation5], %s2154_s7, %s2154_s7, %s2155_s13  }
  0x2f   :  { %s2156_s16 = smov [#allocation9]   ;;  %s2157_s18 = smov [#allocation10]  }
  0x30   :  { %s74_s17 = sshll.u32 %s2156_s16, 4  ;;  %s87_s19 = sshll.u32 %s2157_s18, 4  ;;  %s75_s17 = int_to_ptr.vmem [resolvable:$true] %s74_s17  ;;  %s88_s19 = int_to_ptr.vmem [resolvable:$true] %s87_s19 }
  0x31   :  { %s2110_s2 = scalar_lea.vmem %s75_s17, 1024  ;;  %p2115_p7 = scmp.lt.s32.totalorder %s75_s17, %s75_s17 }
  0x32   :  { %p2111_p6 = scmp.ne.s32.totalorder %s75_s17, %s2110_s2  ;;  %p2116_p8 = scmp.lt.s32.totalorder %s2110_s2, %s2110_s2 }
  0x34   :  { %p2117_p9 = por %p2116_p8, %p2115_p7 }
  0x36   :  { %p2118_p10 = pnand %p2117_p9, %p2111_p6 }
  0x38   :  { %2121 = shalt.err (!%p2118_p10)
}
  0x39   :  { %80 = dma.hbm_to_vmem [thread:$0]  %s2609_s8, 1024, %s75_s17, [#allocation8], %s2154_s7, %s2154_s7, %s2155_s13  }
  0x3a   :  { %s2130_s6 = scalar_lea.vmem %s88_s19, 16  ;;  %s2134_s22 = scalar_lea.vmem %s88_s19, 32 }
  0x3b   :  { %p2131_p11 = scmp.ne.s32.totalorder %s88_s19, %s2130_s6  ;;  %p2135_p12 = scmp.lt.s32.totalorder %s88_s19, %s88_s19 }
  0x3c   :  { %p2136_p13 = scmp.lt.s32.totalorder %s2134_s22, %s2130_s6 }
  0x3e   :  { %p2137_p0 = por %p2136_p13, %p2135_p12 }
  0x40   :  { %p2138_p1 = pnand %p2137_p0, %p2131_p11 }
  0x42   :  { %2141 = shalt.err (!%p2138_p1)
}
  0x43   :  { %90 = dma.hbm_to_vmem [thread:$0]  %s2610_s9, 16, %s88_s19, [#allocation11]  }
  0x44   :  { %2142 = dma.done.wait [#allocation3], 16  }
  0x45   :  { %2143 = vsyncadd [#allocation3], 4294967280 }
  0x46   :  { %2144 = dma.done.wait [#allocation5], 272  }
  0x47   :  { %2145 = vsyncadd [#allocation5], 4294967024 }
  0x48   :  { %2146 = dma.done.wait [#allocation8], 1040  }
  0x49   :  { %2147 = vsyncadd [#allocation8], 4294966256 }
  0x4a   :  { %2148 = dma.done.wait [#allocation11], 16  }
  0x4b   :  { %2149 = vsyncadd [#allocation11], 4294967280  ;;  %v1868_v0 = vld [vmem:[%s2602_s1 + $0x38] sm:$0xff]   ;;  %v1869_v1 = vld [vmem:[%s2602_s1 + $0x30] sm:$0xff]   ;;  %v110_v2 = vlaneseq  ;;  %v2158_v9 = vmov 1.0|1.0  }
  0x4c   :  { %1747 = vmatprep.subr.bf16.mxu0 %v1868_v0  ;;  %v1870_v3 = vld [vmem:[%s2602_s1 + $0x28] sm:$0xff]   ;;  %v1871_v5 = vld [vmem:[%s2602_s1 + $0x20] sm:$0xff]   ;;  %v1872_v8 = vld [vmem:[%s2602_s1 + $0x18] sm:$0xff]   ;;  %v2160_v35 = vmov 0   ;;  %vm333_vm12 = vcmask 261120   ;;  %vm2162_vm13 = vmmov 0  }
  0x4d   :  { %1748 = vmatpush3.bf16.msra.mxu0 %v1868_v0  ;;  %v2249_v4 = vand.u32 127, %v110_v2  ;;  %v112_v6 = vld [vmem:[%s2601_s0] sm:$0xff]  ;;  %v113_v7 = vld [vmem:[%s2601_s0 + $0x8] sm:$0xff]  ;;  %v1873_v10 = vld [vmem:[%s2602_s1 + $0x10] sm:$0xff]   ;;  %474 = vmatprep.mubr.bf16.mxu1 %v2160_v35 }
  0x4e   :  { %1749 = vmatprep.subr.bf16.mxu0 %v1869_v1  ;;  %v1874_v11 = vld [vmem:[%s2602_s1 + $0x8] sm:$0xff]   ;;  %v1875_v12 = vld [vmem:[%s2602_s1] sm:$0xff]   ;;  %v114_v13 = vld [vmem:[%s2601_s0 + $0x10] sm:$0xff]  ;;  %s2159_s1 = smov 32  }
  0x4f   :  { %vm120_vm0 = vcmp.eq.s32.totalorder %v112_v6, %v2249_v4  ;;  %vm121_vm1 = vcmp.eq.s32.totalorder %v113_v7, %v2249_v4  ;;  %v115_v14 = vld [vmem:[%s2601_s0 + $0x18] sm:$0xff]  ;;  %vm122_vm3 = vcmp.eq.s32.totalorder %v114_v13, %v2249_v4  ;;  %v2286_v16 = vld [vmem:[#allocation2] ss:$0 sm:$0xff]  ;;  %v117_v32 = vld [vmem:[%s2601_s0 + $0x28] sm:$0xff]  ;;  %v2161_v13 = vmov 0.0  }
  0x50   :  { %vm1643_vm2 = vmpackc.low %vm121_vm1, %vm120_vm0  ;;  %vm123_vm4 = vcmp.eq.s32.totalorder %v115_v14, %v2249_v4  ;;  %v2297_v29 = vld [vmem:[%s2604_s3 + $0x14] ss:$8 sps:$4 sm:$0xff]   ;;  %v2302_v30 = vld [vmem:[%s2604_s3 + $0x10] ss:$8 sps:$4 sm:$0xff]   ;;  %vm125_vm7 = vcmp.eq.s32.totalorder %v117_v32, %v2249_v4 }
  0x51   :  { %1750 = vmatpush3.bf16.msra.mxu0 %v1869_v1  ;;  %1763 = vmatprep.mubr.msk.bf16.mxu0 %vm1643_vm2, %v2158_v9  ;;  %vm1645_vm5 = vmpackc.low %vm123_vm4, %vm122_vm3  ;;  %v116_v31 = vld [vmem:[%s2601_s0 + $0x20] sm:$0xff]  ;;  %v118_v33 = vld [vmem:[%s2601_s0 + $0x30] sm:$0xff] }
  0x52   :  { %1751 = vmatprep.subr.bf16.mxu0 %v1870_v3  ;;  %vm124_vm6 = vcmp.eq.s32.totalorder %v116_v31, %v2249_v4  ;;  %v119_v34 = vld [vmem:[%s2601_s0 + $0x38] sm:$0xff]  ;;  %vm126_vm8 = vcmp.eq.s32.totalorder %v118_v33, %v2249_v4  ;;  %v2325_v36 = vld [vmem:[%s2604_s3 + $0x4] ss:$8 sps:$4 sm:$0xff]   ;;  %454 = vmatprep.subr.bf16.mxu1 %v2297_v29  ;;  %v2332_v37 = vld [vmem:[%s2604_s3] ss:$8 sps:$4 sm:$0xff]  }
  0x53   :  { %vm127_vm9 = vcmp.eq.s32.totalorder %v119_v34, %v2249_v4  ;;  %vm1647_vm10 = vmpackc.low %vm125_vm7, %vm124_vm6  ;;  %455 = vmatpush1.bf16.msra.mxu1 %v2302_v30  ;;  %v2362_v51 = vld [vmem:[#allocation4] ss:$0 sm:$0xff] }
  0x54   :  { %vm1649_vm11 = vmpackc.low %vm127_vm9, %vm126_vm8  ;;  %456 = vmatprep.subr.bf16.mxu1 %v2325_v36 }
  0x55   :  { %1752 = vmatpush3.bf16.msra.mxu0 %v1870_v3 }
  0x56   :  { %1753 = vmatprep.subr.bf16.mxu0 %v1871_v5 }
  0x57   :  { %457 = vmatpush1.bf16.msra.mxu1 %v2332_v37 }
  0x58   :  { %1771 = vmatprep.subr.bf16.mxu1 %v2161_v13 }
  0x59   :  { %1754 = vmatpush3.bf16.msra.mxu0 %v1871_v5 }
  0x5a   :  { %1755 = vmatprep.subr.bf16.mxu0 %v1872_v8 }
  0x5d   :  { %1756 = vmatpush3.bf16.msra.mxu0 %v1872_v8 }
  0x5e   :  { %1757 = vmatprep.subr.bf16.mxu0 %v1873_v10 }
  0x61   :  { %1758 = vmatpush3.bf16.msra.mxu0 %v1873_v10 }
  0x62   :  { %1759 = vmatprep.subr.bf16.mxu0 %v1874_v11 }
  0x65   :  { %1760 = vmatpush3.bf16.msra.mxu0 %v1874_v11 }
  0x66   :  { %1761 = vmatprep.subr.bf16.mxu0 %v1875_v12 }
  0x69   :  { %1762 = vmatpush3.bf16.msra.mxu0 %v1875_v12 }
  0x6a   :  { %349 = vmatprep.subr.bf16.mxu0 %v2297_v29 }
  0x6c   :  { %1764 = vmatmul.mubr.msk.bf16.vlgmr.msra.gmra.mxu0 %vm1645_vm5, %v2158_v9 }
  0x6d   :  { %350 = vmatpush1.bf16.msra.mxu0 %v2302_v30  ;;  %1767 = vmatprep.mubr.msk.bf16.mxu0 %vm1647_vm10, %v2158_v9 }
  0x6e   :  { %351 = vmatprep.subr.bf16.mxu0 %v2325_v36 }
  0x71   :  { %352 = vmatpush1.bf16.msra.mxu0 %v2332_v37 }
  0x72   :  { %758 = vmatprep.subr.bf16.mxu0 %v2297_v29 }
  0x74   :  { %1768 = vmatmul.mubr.msk.bf16.gmra.mxu0 %vm1649_vm11, %v2158_v9 }
  0x75   :  { %369 = vmatprep.mubr.bf16.mxu0 %v2160_v35 }
 0x12c   :  { %v2284_v15 = vpop.f32.mrf.mxu0 }
 0x12e   :  { %v245_v17 = vpop.f32.mrf.mxu0 }
 0x12f   :  { %v246_v18 = vadd.f32 %v2286_v16, %v245_v17 }
 0x130   :  { %v2351_v43 = vpop.f32.mrf.mxu0 }
 0x131   :  { %1894 = vtanh.f32 %v246_v18  ;;  %v1651_v20 = vmul.f32 -1.442695, %v246_v18 }
 0x132   :  { %v248_v44 = vpop.f32.mrf.mxu0 }
 0x133   :  { %1896 = vpow2.f32 %v1651_v20  ;;  %v249_v49 = vadd.f32 %v2286_v16, %v248_v44 }
 0x134   :  { %v2353_v45 = vpop.f32.mrf.mxu0 }
 0x136   :  { %v2355_v46 = vpop.f32.mrf.mxu0 }
 0x138   :  { %v2357_v47 = vpop.f32.mrf.mxu0 }
 0x13a   :  { %v2359_v48 = vpop.f32.mrf.mxu0 }
 0x13e   :  { %v1895_v19 = vpop.eup %1894 }
 0x13f   :  { %294 = vrot.lane.b32.xlu0 %v1895_v19, %s2154_s7 }
 0x140   :  { %v1897_v21 = vpop.eup %1896 }
 0x141   :  { %v288_v22 = vadd.f32 1.0, %v1897_v21 }
 0x143   :  { %1898 = vrcp.f32 %v288_v22 }
 0x150   :  { %v1899_v23 = vpop.eup %1898 }
 0x151   :  { %v292_v26 = vmul.f32 0.0, %v1899_v23 }
 0x1b1   :  { %v295_v24 = vpop.permute.xlu0 %294 }
 0x1b2   :  { %v297_v25 = vmul.f32 %v1899_v23, %v295_v24  ;;  %v2384_v24 = vld [vmem:[%s2605_s4 + $0x8] sm:$0xff]  }
 0x1b4   :  { %299 = vrot.lane.b32.xlu0 %v297_v25, %s2159_s1 }
 0x226   :  { %v300_v27 = vpop.permute.xlu0 %299 }
 0x227   :  { %v2291_v28 = vadd.f32 %v300_v27, %v292_v26  ;;  %v2391_v26 = vld [vmem:[%s2605_s4] sm:$0xff]  }
 0x229   :  { %1900 = vtanh.f32 %v2291_v28 }
 0x236   :  { %v1901_v38 = vpop.eup %1900 }
 0x237   :  { %305 = vrot.lane.b32.xlu1 %v1901_v38, %s2154_s7 }
 0x2a9   :  { %v306_v39 = vpop.permute.xlu1 %305 }
 0x2aa   :  { %v308_v40 = vmul.f32 %v1899_v23, %v306_v39 }
 0x2ac   :  { %v309_v41 = vpack.c.bf16 %v308_v40, %v308_v40 }
 0x2ae   :  { %311 = vrot.lane.b32.xlu1 %v309_v41, %s2159_s1 }
 0x320   :  { %v312_v42 = vpop.permute.xlu1 %311 }
 0x321   :  { %1656 = vmatmul.mubr.msk.bf16.vlgmr.msra.gmra.mxu0 %vm333_vm12, %v312_v42 }
 0x322   :  { %759 = vmatpush1.bf16.msra.mxu0 %v2302_v30  ;;  %778 = vmatprep.mubr.bf16.mxu0 %v2160_v35 }
 0x323   :  { %760 = vmatprep.subr.bf16.mxu0 %v2325_v36 }
 0x326   :  { %761 = vmatpush1.bf16.msra.mxu0 %v2332_v37 }
 0x327   :  { %904 = vmatprep.subr.bf16.mxu0 %v2297_v29 }
 0x3e1   :  { %v371_v50 = vpop.f32.mrf.mxu0 }
 0x3e2   :  { %v410_v52 = vadd.f32 %v371_v50, %v249_v49 }
 0x3e3   :  { %v373_v53 = vpop.f32.mrf.mxu0 }
 0x3e4   :  { %1902 = vtanh.f32 %v410_v52  ;;  %v384_v54 = vadd.f32 %v2362_v51, %v373_v53  ;;  %v1659_v59 = vmul.f32 -1.442695, %v410_v52 }
 0x3e5   :  { %v375_v55 = vpop.f32.mrf.mxu0 }
 0x3e6   :  { %1904 = vtanh.f32 %v384_v54  ;;  %v1658_v60 = vmul.f32 -1.442695, %v384_v54 }
 0x3e7   :  { %v376_v56 = vpop.f32.mrf.mxu0  ;;  %1906 = vpow2.f32 %v1659_v59 }
 0x3e8   :  { %1908 = vpow2.f32 %v1658_v60 }
 0x3f1   :  { %v1903_v57 = vpop.eup %1902 }
 0x3f2   :  { %420 = vrot.lane.b32.xlu0 %v1903_v57, %s2154_s7 }
 0x3f3   :  { %v1905_v58 = vpop.eup %1904 }
 0x3f4   :  { %394 = vrot.lane.b32.xlu1 %v1905_v58, %s2154_s7  ;;  %v1907_v61 = vpop.eup %1906 }
 0x3f5   :  { %v1909_v62 = vpop.eup %1908  ;;  %v414_v63 = vadd.f32 1.0, %v1907_v61 }
 0x3f6   :  { %v388_v0 = vadd.f32 1.0, %v1909_v62 }
 0x3f7   :  { %1910 = vrcp.f32 %v414_v63 }
 0x3f8   :  { %1912 = vrcp.f32 %v388_v0 }
 0x404   :  { %v1911_v1 = vpop.eup %1910 }
 0x405   :  { %v1913_v4 = vpop.eup %1912  ;;  %v418_v7 = vmul.f32 %v1911_v1, %v2291_v28  ;;  %v254_v28 = vadd.f32 %v2284_v15, %v2286_v16 }
 0x406   :  { %v392_v10 = vmul.f32 0.0, %v1913_v4 }
 0x464   :  { %v421_v2 = vpop.permute.xlu0 %420 }
 0x465   :  { %v423_v3 = vmul.f32 %v1911_v1, %v421_v2 }
 0x466   :  { %v395_v5 = vpop.permute.xlu1 %394 }
 0x467   :  { %425 = vrot.lane.b32.xlu0 %v423_v3, %s2159_s1  ;;  %v397_v6 = vmul.f32 %v1913_v4, %v395_v5 }
 0x469   :  { %399 = vrot.lane.b32.xlu1 %v397_v6, %s2159_s1 }
 0x4d9   :  { %v426_v8 = vpop.permute.xlu0 %425 }
 0x4da   :  { %v2370_v9 = vadd.f32 %v426_v8, %v418_v7 }
 0x4db   :  { %v400_v11 = vpop.permute.xlu1 %399 }
 0x4dc   :  { %1914 = vtanh.f32 %v2370_v9  ;;  %v2373_v12 = vadd.f32 %v400_v11, %v392_v10 }
 0x4de   :  { %1916 = vtanh.f32 %v2373_v12 }
 0x4e9   :  { %v1915_v14 = vpop.eup %1914 }
 0x4ea   :  { %431 = vrot.lane.b32.xlu0 %v1915_v14, %s2154_s7 }
 0x4eb   :  { %v1917_v17 = vpop.eup %1916 }
 0x4ec   :  { %405 = vrot.lane.b32.xlu1 %v1917_v17, %s2154_s7 }
 0x55c   :  { %v432_v18 = vpop.permute.xlu0 %431 }
 0x55d   :  { %v434_v19 = vmul.f32 %v1911_v1, %v432_v18 }
 0x55e   :  { %v406_v21 = vpop.permute.xlu1 %405 }
 0x55f   :  { %v435_v20 = vpack.c.bf16 %v434_v19, %v434_v19  ;;  %v408_v22 = vmul.f32 %v1913_v4, %v406_v21  ;;  %v257_v19 = vadd.f32 %v2351_v43, %v2286_v16 }
 0x561   :  { %437 = vrot.lane.b32.xlu0 %v435_v20, %s2159_s1  ;;  %v409_v23 = vpack.c.bf16 %v408_v22, %v408_v22 }
 0x563   :  { %485 = vrot.lane.b32.xlu1 %v409_v23, %s2159_s1 }
 0x5d3   :  { %v438_v25 = vpop.permute.xlu0 %437 }
 0x5d4   :  { %1660 = vmatmul.mubr.msk.bf16.vlgmr.msra.gmra.mxu1 %vm333_vm12, %v438_v25 }
 0x5d5   :  { %1772 = vmatpush3.bf16.msra.mxu1 %v2384_v24  ;;  %1775 = vmatprep.mubr.msk.bf16.mxu1 %vm2162_vm13, %v2161_v13  ;;  %v486_v27 = vpop.permute.xlu1 %485 }
 0x5d6   :  { %1773 = vmatprep.subr.bf16.mxu1 %v2161_v13 }
 0x5d9   :  { %1774 = vmatpush3.bf16.msra.mxu1 %v2391_v26 }
 0x5da   :  { %612 = vmatprep.subr.bf16.mxu1 %v2297_v29 }
 0x5dc   :  { %1776 = vmatmul.mubr.msk.bf16.vlgmr.msra.gmra.mxu1 %vm333_vm12, %v486_v27 }
 0x5dd   :  { %613 = vmatpush1.bf16.msra.mxu1 %v2302_v30  ;;  %632 = vmatprep.mubr.bf16.mxu1 %v2160_v35 }
 0x5de   :  { %614 = vmatprep.subr.bf16.mxu1 %v2325_v36 }
 0x5e1   :  { %615 = vmatpush1.bf16.msra.mxu1 %v2332_v37 }
 0x5e2   :  { %1779 = vmatprep.subr.bf16.mxu1 %v2161_v13 }
 0x694   :  { %v476_v31 = vpop.f32.mrf.mxu1 }
 0x695   :  { %v568_v32 = vadd.f32 %v476_v31, %v254_v28 }
 0x696   :  { %v478_v33 = vpop.f32.mrf.mxu1 }
 0x697   :  { %1918 = vtanh.f32 %v568_v32  ;;  %v483_v39 = vadd.f32 %v2362_v51, %v478_v33  ;;  %v1665_v15 = vmul.f32 -1.442695, %v568_v32 }
 0x698   :  { %v480_v34 = vpop.f32.mrf.mxu1 }
 0x69a   :  { %v481_v38 = vpop.f32.mrf.mxu1 }
 0x69c   :  { %v536_v40 = vpop.f32.mrf.mxu1 }
 0x69d   :  { %v542_v41 = vadd.f32 %v536_v40, %v483_v39 }
 0x69e   :  { %v1777_v42 = vpop.f32.mrf.mxu1 }
 0x69f   :  { %1920 = vtanh.f32 %v542_v41  ;;  %v1664_v53 = vmul.f32 -1.442695, %v542_v41 }
 0x6a0   :  { %v539_v44 = vpop.f32.mrf.mxu1  ;;  %1922 = vpow2.f32 %v1665_v15 }
 0x6a1   :  { %1924 = vpow2.f32 %v1664_v53 }
 0x6a2   :  { %v1778_v49 = vpop.f32.mrf.mxu1 }
 0x6a4   :  { %v1919_v50 = vpop.eup %1918 }
 0x6a5   :  { %578 = vrot.lane.b32.xlu0 %v1919_v50, %s2154_s7 }
 0x6ac   :  { %v1921_v52 = vpop.eup %1920 }
 0x6ad   :  { %552 = vrot.lane.b32.xlu1 %v1921_v52, %s2154_s7  ;;  %v1923_v54 = vpop.eup %1922 }
 0x6ae   :  { %v572_v55 = vadd.f32 1.0, %v1923_v54  ;;  %v1925_v56 = vpop.eup %1924 }
 0x6af   :  { %v546_v57 = vadd.f32 1.0, %v1925_v56 }
 0x6b0   :  { %1926 = vrcp.f32 %v572_v55 }
 0x6b1   :  { %1928 = vrcp.f32 %v546_v57 }
 0x6bd   :  { %v1927_v58 = vpop.eup %1926 }
 0x6be   :  { %v1929_v61 = vpop.eup %1928  ;;  %v576_v0 = vmul.f32 %v1927_v58, %v2370_v9 }
 0x6bf   :  { %v550_v3 = vmul.f32 %v1929_v61, %v2373_v12 }
 0x717   :  { %v579_v59 = vpop.permute.xlu0 %578 }
 0x718   :  { %v581_v60 = vmul.f32 %v1927_v58, %v579_v59 }
 0x71a   :  { %583 = vrot.lane.b32.xlu0 %v581_v60, %s2159_s1 }
 0x71f   :  { %v553_v62 = vpop.permute.xlu1 %552 }
 0x720   :  { %v555_v63 = vmul.f32 %v1929_v61, %v553_v62 }
 0x722   :  { %557 = vrot.lane.b32.xlu1 %v555_v63, %s2159_s1 }
 0x78c   :  { %v584_v1 = vpop.permute.xlu0 %583 }
 0x78d   :  { %v2412_v2 = vadd.f32 %v584_v1, %v576_v0 }
 0x78f   :  { %1930 = vtanh.f32 %v2412_v2 }
 0x794   :  { %v558_v4 = vpop.permute.xlu1 %557 }
 0x795   :  { %v2416_v5 = vadd.f32 %v558_v4, %v550_v3 }
 0x797   :  { %1932 = vtanh.f32 %v2416_v5 }
 0x79c   :  { %v1931_v6 = vpop.eup %1930 }
 0x79d   :  { %589 = vrot.lane.b32.xlu0 %v1931_v6, %s2154_s7 }
 0x7a4   :  { %v1933_v7 = vpop.eup %1932 }
 0x7a5   :  { %563 = vrot.lane.b32.xlu1 %v1933_v7, %s2154_s7 }
 0x80f   :  { %v590_v8 = vpop.permute.xlu0 %589 }
 0x810   :  { %v592_v9 = vmul.f32 %v1927_v58, %v590_v8  ;;  %v262_v8 = vadd.f32 %v2286_v16, %v2355_v46 }
 0x812   :  { %v593_v10 = vpack.c.bf16 %v592_v9, %v592_v9 }
 0x814   :  { %595 = vrot.lane.b32.xlu0 %v593_v10, %s2159_s1 }
 0x817   :  { %v564_v11 = vpop.permute.xlu1 %563 }
 0x818   :  { %v566_v14 = vmul.f32 %v1929_v61, %v564_v11 }
 0x81a   :  { %v567_v17 = vpack.c.bf16 %v566_v14, %v566_v14 }
 0x81c   :  { %643 = vrot.lane.b32.xlu1 %v567_v17, %s2159_s1 }
 0x886   :  { %v596_v12 = vpop.permute.xlu0 %595 }
 0x887   :  { %1666 = vmatmul.mubr.msk.bf16.vlgmr.msra.gmra.mxu1 %vm333_vm12, %v596_v12 }
 0x888   :  { %1780 = vmatpush3.bf16.msra.mxu1 %v2384_v24  ;;  %1783 = vmatprep.mubr.msk.bf16.mxu1 %vm2162_vm13, %v2161_v13 }
 0x889   :  { %1781 = vmatprep.subr.bf16.mxu1 %v2161_v13 }
 0x88c   :  { %1782 = vmatpush3.bf16.msra.mxu1 %v2391_v26 }
 0x88d   :  { %1787 = vmatprep.subr.bf16.mxu1 %v2161_v13 }
 0x88e   :  { %v644_v18 = vpop.permute.xlu1 %643 }
 0x88f   :  { %1784 = vmatmul.mubr.msk.bf16.vlgmr.msra.gmra.mxu1 %vm333_vm12, %v644_v18 }
 0x890   :  { %1788 = vmatpush3.bf16.msra.mxu1 %v2384_v24  ;;  %1791 = vmatprep.mubr.msk.bf16.mxu1 %vm2162_vm13, %v2161_v13 }
 0x891   :  { %1789 = vmatprep.subr.bf16.mxu1 %v2161_v13 }
 0x894   :  { %1790 = vmatpush3.bf16.msra.mxu1 %v2391_v26 }
 0x895   :  { %1795 = vmatprep.subr.bf16.mxu1 %v2161_v13 }
 0x947   :  { %v634_v20 = vpop.f32.mrf.mxu1 }
 0x948   :  { %v714_v21 = vadd.f32 %v634_v20, %v257_v19 }
 0x949   :  { %v636_v22 = vpop.f32.mrf.mxu1 }
 0x94a   :  { %1934 = vtanh.f32 %v714_v21  ;;  %v641_v27 = vadd.f32 %v2362_v51, %v636_v22  ;;  %v1669_v43 = vmul.f32 -1.442695, %v714_v21 }
 0x94b   :  { %v638_v23 = vpop.f32.mrf.mxu1 }
 0x94d   :  { %v639_v25 = vpop.f32.mrf.mxu1 }
 0x94f   :  { %v682_v28 = vpop.f32.mrf.mxu1 }
 0x950   :  { %v688_v31 = vadd.f32 %v682_v28, %v641_v27 }
 0x951   :  { %v1785_v32 = vpop.f32.mrf.mxu1 }
 0x952   :  { %1936 = vtanh.f32 %v688_v31  ;;  %v1668_v40 = vmul.f32 -1.442695, %v688_v31 }
 0x953   :  { %v685_v33 = vpop.f32.mrf.mxu1  ;;  %1938 = vpow2.f32 %v1669_v43 }
 0x954   :  { %1940 = vpow2.f32 %v1668_v40 }
 0x955   :  { %v1786_v34 = vpop.f32.mrf.mxu1 }
 0x957   :  { %v1935_v38 = vpop.eup %1934 }
 0x958   :  { %724 = vrot.lane.b32.xlu0 %v1935_v38, %s2154_s7 }
 0x95f   :  { %v1937_v39 = vpop.eup %1936 }
 0x960   :  { %698 = vrot.lane.b32.xlu1 %v1937_v39, %s2154_s7  ;;  %v1939_v41 = vpop.eup %1938 }
 0x961   :  { %v718_v42 = vadd.f32 1.0, %v1939_v41  ;;  %v1941_v44 = vpop.eup %1940 }
 0x962   :  { %v692_v49 = vadd.f32 1.0, %v1941_v44 }
 0x963   :  { %1942 = vrcp.f32 %v718_v42 }
 0x964   :  { %1944 = vrcp.f32 %v692_v49 }
 0x970   :  { %v1943_v50 = vpop.eup %1942 }
 0x971   :  { %v1945_v53 = vpop.eup %1944  ;;  %v722_v56 = vmul.f32 %v1943_v50, %v2412_v2 }
 0x972   :  { %v696_v59 = vmul.f32 %v1945_v53, %v2416_v5 }
 0x9ca   :  { %v725_v52 = vpop.permute.xlu0 %724 }
 0x9cb   :  { %v727_v15 = vmul.f32 %v1943_v50, %v725_v52 }
 0x9cd   :  { %729 = vrot.lane.b32.xlu0 %v727_v15, %s2159_s1 }
 0x9d2   :  { %v699_v54 = vpop.permute.xlu1 %698 }
 0x9d3   :  { %v701_v55 = vmul.f32 %v1945_v53, %v699_v54 }
 0x9d5   :  { %703 = vrot.lane.b32.xlu1 %v701_v55, %s2159_s1 }
 0xa3f   :  { %v730_v57 = vpop.permute.xlu0 %729 }
 0xa40   :  { %v2445_v58 = vadd.f32 %v730_v57, %v722_v56 }
 0xa42   :  { %1946 = vtanh.f32 %v2445_v58 }
 0xa47   :  { %v704_v60 = vpop.permute.xlu1 %703 }
 0xa48   :  { %v2449_v61 = vadd.f32 %v704_v60, %v696_v59 }
 0xa4a   :  { %1948 = vtanh.f32 %v2449_v61 }
 0xa4f   :  { %v1947_v62 = vpop.eup %1946 }
 0xa50   :  { %735 = vrot.lane.b32.xlu0 %v1947_v62, %s2154_s7 }
 0xa57   :  { %v1949_v63 = vpop.eup %1948 }
 0xa58   :  { %709 = vrot.lane.b32.xlu1 %v1949_v63, %s2154_s7  ;;  %v265_v63 = vadd.f32 %v2286_v16, %v2359_v48 }
 0xac2   :  { %v736_v0 = vpop.permute.xlu0 %735 }
 0xac3   :  { %v738_v1 = vmul.f32 %v1943_v50, %v736_v0 }
 0xac5   :  { %v739_v2 = vpack.c.bf16 %v738_v1, %v738_v1 }
 0xac7   :  { %741 = vrot.lane.b32.xlu0 %v739_v2, %s2159_s1 }
 0xaca   :  { %v710_v3 = vpop.permute.xlu1 %709 }
 0xacb   :  { %v712_v4 = vmul.f32 %v1945_v53, %v710_v3 }
 0xacd   :  { %v713_v6 = vpack.c.bf16 %v712_v4, %v712_v4 }
 0xacf   :  { %789 = vrot.lane.b32.xlu1 %v713_v6, %s2159_s1 }
 0xb39   :  { %v742_v5 = vpop.permute.xlu0 %741 }
 0xb3a   :  { %1670 = vmatmul.mubr.msk.bf16.vlgmr.msra.gmra.mxu0 %vm333_vm12, %v742_v5 }
 0xb3b   :  { %905 = vmatpush1.bf16.msra.mxu0 %v2302_v30  ;;  %924 = vmatprep.mubr.bf16.mxu0 %v2160_v35 }
 0xb3c   :  { %906 = vmatprep.subr.bf16.mxu0 %v2325_v36 }
 0xb3f   :  { %907 = vmatpush1.bf16.msra.mxu0 %v2332_v37 }
 0xb40   :  { %1050 = vmatprep.subr.bf16.mxu0 %v2297_v29 }
 0xb41   :  { %v790_v7 = vpop.permute.xlu1 %789 }
 0xb42   :  { %1792 = vmatmul.mubr.msk.bf16.vlgmr.msra.gmra.mxu1 %vm333_vm12, %v790_v7 }
 0xb43   :  { %1796 = vmatpush3.bf16.msra.mxu1 %v2384_v24  ;;  %1799 = vmatprep.mubr.msk.bf16.mxu1 %vm2162_vm13, %v2161_v13 }
 0xb44   :  { %1797 = vmatprep.subr.bf16.mxu1 %v2161_v13 }
 0xb47   :  { %1798 = vmatpush3.bf16.msra.mxu1 %v2391_v26 }
 0xb48   :  { %1803 = vmatprep.subr.bf16.mxu1 %v2161_v13 }
 0xbfa   :  { %v780_v9 = vpop.f32.mrf.mxu0 }
 0xbfb   :  { %v860_v10 = vadd.f32 %v780_v9, %v262_v8 }
 0xbfc   :  { %v782_v11 = vpop.f32.mrf.mxu0 }
 0xbfd   :  { %1950 = vtanh.f32 %v860_v10  ;;  %v787_v12 = vadd.f32 %v2362_v51, %v782_v11  ;;  %v1673_v46 = vmul.f32 -1.442695, %v860_v10 }
 0xbfe   :  { %v784_v14 = vpop.f32.mrf.mxu0 }
 0xc00   :  { %v785_v17 = vpop.f32.mrf.mxu0 }
 0xc02   :  { %v828_v18 = vpop.f32.mrf.mxu1 }
 0xc03   :  { %v834_v19 = vadd.f32 %v828_v18, %v787_v12 }
 0xc04   :  { %v1793_v20 = vpop.f32.mrf.mxu1 }
 0xc05   :  { %1952 = vtanh.f32 %v834_v19  ;;  %v1672_v27 = vmul.f32 -1.442695, %v834_v19 }
 0xc06   :  { %v831_v21 = vpop.f32.mrf.mxu1  ;;  %1954 = vpow2.f32 %v1673_v46 }
 0xc07   :  { %1956 = vpow2.f32 %v1672_v27 }
 0xc08   :  { %v1794_v22 = vpop.f32.mrf.mxu1 }
 0xc0a   :  { %v1951_v23 = vpop.eup %1950 }
 0xc0b   :  { %870 = vrot.lane.b32.xlu0 %v1951_v23, %s2154_s7 }
 0xc12   :  { %v1953_v25 = vpop.eup %1952 }
 0xc13   :  { %844 = vrot.lane.b32.xlu1 %v1953_v25, %s2154_s7  ;;  %v1955_v28 = vpop.eup %1954 }
 0xc14   :  { %v864_v31 = vadd.f32 1.0, %v1955_v28  ;;  %v1957_v32 = vpop.eup %1956 }
 0xc15   :  { %v838_v33 = vadd.f32 1.0, %v1957_v32 }
 0xc16   :  { %1958 = vrcp.f32 %v864_v31 }
 0xc17   :  { %1960 = vrcp.f32 %v838_v33 }
 0xc23   :  { %v1959_v34 = vpop.eup %1958 }
 0xc24   :  { %v1961_v43 = vpop.eup %1960  ;;  %v868_v42 = vmul.f32 %v1959_v34, %v2445_v58 }
 0xc25   :  { %v842_v50 = vmul.f32 %v1961_v43, %v2449_v61 }
 0xc7d   :  { %v871_v38 = vpop.permute.xlu0 %870 }
 0xc7e   :  { %v873_v39 = vmul.f32 %v1959_v34, %v871_v38 }
 0xc80   :  { %875 = vrot.lane.b32.xlu0 %v873_v39, %s2159_s1 }
 0xc85   :  { %v845_v40 = vpop.permute.xlu1 %844 }
 0xc86   :  { %v847_v41 = vmul.f32 %v1961_v43, %v845_v40 }
 0xc88   :  { %849 = vrot.lane.b32.xlu1 %v847_v41, %s2159_s1 }
 0xcf2   :  { %v876_v44 = vpop.permute.xlu0 %875 }
 0xcf3   :  { %v2477_v49 = vadd.f32 %v876_v44, %v868_v42 }
 0xcf5   :  { %1962 = vtanh.f32 %v2477_v49 }
 0xcfa   :  { %v850_v52 = vpop.permute.xlu1 %849 }
 0xcfb   :  { %v2481_v15 = vadd.f32 %v850_v52, %v842_v50 }
 0xcfd   :  { %1964 = vtanh.f32 %v2481_v15 }
 0xd02   :  { %v1963_v53 = vpop.eup %1962 }
 0xd03   :  { %881 = vrot.lane.b32.xlu0 %v1963_v53, %s2154_s7  ;;  %v270_v53 = vadd.f32 %v2353_v45, %v2286_v16 }
 0xd0a   :  { %v1965_v54 = vpop.eup %1964 }
 0xd0b   :  { %855 = vrot.lane.b32.xlu1 %v1965_v54, %s2154_s7 }
 0xd75   :  { %v882_v55 = vpop.permute.xlu0 %881 }
 0xd76   :  { %v884_v56 = vmul.f32 %v1959_v34, %v882_v55 }
 0xd78   :  { %v885_v57 = vpack.c.bf16 %v884_v56, %v884_v56 }
 0xd7a   :  { %887 = vrot.lane.b32.xlu0 %v885_v57, %s2159_s1 }
 0xd7d   :  { %v856_v58 = vpop.permute.xlu1 %855 }
 0xd7e   :  { %v858_v59 = vmul.f32 %v1961_v43, %v856_v58 }
 0xd80   :  { %v859_v60 = vpack.c.bf16 %v858_v59, %v858_v59 }
 0xd82   :  { %935 = vrot.lane.b32.xlu1 %v859_v60, %s2159_s1 }
 0xdec   :  { %v888_v61 = vpop.permute.xlu0 %887 }
 0xded   :  { %1674 = vmatmul.mubr.msk.bf16.vlgmr.msra.gmra.mxu0 %vm333_vm12, %v888_v61 }
 0xdee   :  { %1051 = vmatpush1.bf16.msra.mxu0 %v2302_v30  ;;  %1070 = vmatprep.mubr.bf16.mxu0 %v2160_v35 }
 0xdef   :  { %1052 = vmatprep.subr.bf16.mxu0 %v2325_v36 }
 0xdf2   :  { %1053 = vmatpush1.bf16.msra.mxu0 %v2332_v37 }
 0xdf3   :  { %1196 = vmatprep.subr.bf16.mxu0 %v2297_v29 }
 0xdf4   :  { %v936_v62 = vpop.permute.xlu1 %935 }
 0xdf5   :  { %1800 = vmatmul.mubr.msk.bf16.vlgmr.msra.gmra.mxu1 %vm333_vm12, %v936_v62 }
 0xdf6   :  { %1804 = vmatpush3.bf16.msra.mxu1 %v2384_v24  ;;  %1807 = vmatprep.mubr.msk.bf16.mxu1 %vm2162_vm13, %v2161_v13 }
 0xdf7   :  { %1805 = vmatprep.subr.bf16.mxu1 %v2161_v13 }
 0xdfa   :  { %1806 = vmatpush3.bf16.msra.mxu1 %v2391_v26 }
 0xdfb   :  { %1811 = vmatprep.subr.bf16.mxu1 %v2161_v13 }
 0xead   :  { %v926_v0 = vpop.f32.mrf.mxu0 }
 0xeae   :  { %v1006_v1 = vadd.f32 %v926_v0, %v265_v63 }
 0xeaf   :  { %v928_v2 = vpop.f32.mrf.mxu0 }
 0xeb0   :  { %1966 = vtanh.f32 %v1006_v1  ;;  %v933_v6 = vadd.f32 %v2362_v51, %v928_v2  ;;  %v1677_v48 = vmul.f32 -1.442695, %v1006_v1 }
 0xeb1   :  { %v930_v3 = vpop.f32.mrf.mxu0 }
 0xeb3   :  { %v931_v4 = vpop.f32.mrf.mxu0 }
 0xeb5   :  { %v974_v5 = vpop.f32.mrf.mxu1 }
 0xeb6   :  { %v980_v7 = vadd.f32 %v974_v5, %v933_v6 }
 0xeb7   :  { %v1801_v8 = vpop.f32.mrf.mxu1 }
 0xeb8   :  { %1968 = vtanh.f32 %v980_v7  ;;  %v1676_v17 = vmul.f32 -1.442695, %v980_v7 }
 0xeb9   :  { %v977_v9 = vpop.f32.mrf.mxu1  ;;  %1970 = vpow2.f32 %v1677_v48 }
 0xeba   :  { %1972 = vpow2.f32 %v1676_v17 }
 0xebb   :  { %v1802_v10 = vpop.f32.mrf.mxu1 }
 0xebd   :  { %v1967_v11 = vpop.eup %1966 }
 0xebe   :  { %1016 = vrot.lane.b32.xlu0 %v1967_v11, %s2154_s7 }
 0xec5   :  { %v1969_v14 = vpop.eup %1968 }
 0xec6   :  { %990 = vrot.lane.b32.xlu1 %v1969_v14, %s2154_s7  ;;  %v1971_v12 = vpop.eup %1970 }
 0xec7   :  { %v1010_v18 = vadd.f32 1.0, %v1971_v12  ;;  %v1973_v19 = vpop.eup %1972 }
 0xec8   :  { %v984_v20 = vadd.f32 1.0, %v1973_v19 }
 0xec9   :  { %1974 = vrcp.f32 %v1010_v18 }
 0xeca   :  { %1976 = vrcp.f32 %v984_v20 }
 0xed6   :  { %v1975_v21 = vpop.eup %1974 }
 0xed7   :  { %v1977_v25 = vpop.eup %1976  ;;  %v1014_v28 = vmul.f32 %v1975_v21, %v2477_v49 }
 0xed8   :  { %v988_v33 = vmul.f32 %v1977_v25, %v2481_v15 }
 0xf30   :  { %v1017_v22 = vpop.permute.xlu0 %1016 }
 0xf31   :  { %v1019_v23 = vmul.f32 %v1975_v21, %v1017_v22 }
 0xf33   :  { %1021 = vrot.lane.b32.xlu0 %v1019_v23, %s2159_s1 }
 0xf38   :  { %v991_v46 = vpop.permute.xlu1 %990 }
 0xf39   :  { %v993_v27 = vmul.f32 %v1977_v25, %v991_v46 }
 0xf3b   :  { %995 = vrot.lane.b32.xlu1 %v993_v27, %s2159_s1 }
 0xfa5   :  { %v1022_v31 = vpop.permute.xlu0 %1021 }
 0xfa6   :  { %v2509_v32 = vadd.f32 %v1022_v31, %v1014_v28 }
 0xfa8   :  { %1978 = vtanh.f32 %v2509_v32 }
 0xfad   :  { %v996_v34 = vpop.permute.xlu1 %995 }
 0xfae   :  { %v2513_v38 = vadd.f32 %v996_v34, %v988_v33 }
 0xfb0   :  { %1980 = vtanh.f32 %v2513_v38 }
 0xfb5   :  { %v1979_v39 = vpop.eup %1978 }
 0xfb6   :  { %1027 = vrot.lane.b32.xlu0 %v1979_v39, %s2154_s7 }
 0xfbd   :  { %v1981_v43 = vpop.eup %1980 }
 0xfbe   :  { %1001 = vrot.lane.b32.xlu1 %v1981_v43, %s2154_s7 }
0x1028   :  { %v1028_v40 = vpop.permute.xlu0 %1027 }
0x1029   :  { %v1030_v41 = vmul.f32 %v1975_v21, %v1028_v40 }
0x102b   :  { %v1031_v42 = vpack.c.bf16 %v1030_v41, %v1030_v41 }
0x102d   :  { %1033 = vrot.lane.b32.xlu0 %v1031_v42, %s2159_s1 }
0x1030   :  { %v1002_v44 = vpop.permute.xlu1 %1001 }
0x1031   :  { %v1004_v49 = vmul.f32 %v1977_v25, %v1002_v44 }
0x1033   :  { %v1005_v50 = vpack.c.bf16 %v1004_v49, %v1004_v49 }
0x1035   :  { %1081 = vrot.lane.b32.xlu1 %v1005_v50, %s2159_s1 }
0x109f   :  { %v1034_v52 = vpop.permute.xlu0 %1033 }
0x10a0   :  { %1678 = vmatmul.mubr.msk.bf16.vlgmr.msra.gmra.mxu0 %vm333_vm12, %v1034_v52 }
0x10a1   :  { %1197 = vmatpush1.bf16.msra.mxu0 %v2302_v30  ;;  %1216 = vmatprep.mubr.bf16.mxu0 %v2160_v35 }
0x10a2   :  { %1198 = vmatprep.subr.bf16.mxu0 %v2325_v36 }
0x10a5   :  { %1199 = vmatpush1.bf16.msra.mxu0 %v2332_v37 }
0x10a6   :  { %1342 = vmatprep.subr.bf16.mxu0 %v2297_v29 }
0x10a7   :  { %v1082_v15 = vpop.permute.xlu1 %1081 }
0x10a8   :  { %1808 = vmatmul.mubr.msk.bf16.vlgmr.msra.gmra.mxu1 %vm333_vm12, %v1082_v15 }
0x10a9   :  { %1812 = vmatpush3.bf16.msra.mxu1 %v2384_v24  ;;  %1815 = vmatprep.mubr.msk.bf16.mxu1 %vm2162_vm13, %v2161_v13 }
0x10aa   :  { %1813 = vmatprep.subr.bf16.mxu1 %v2161_v13 }
0x10ad   :  { %1814 = vmatpush3.bf16.msra.mxu1 %v2391_v26 }
0x10ae   :  { %1819 = vmatprep.subr.bf16.mxu1 %v2161_v13 }
0x1160   :  { %v1072_v54 = vpop.f32.mrf.mxu0 }
0x1161   :  { %v1152_v55 = vadd.f32 %v1072_v54, %v270_v53 }
0x1162   :  { %v1074_v29 = vpop.f32.mrf.mxu0 }
0x1163   :  { %1982 = vtanh.f32 %v1152_v55  ;;  %v1079_v58 = vadd.f32 %v2362_v51, %v1074_v29  ;;  %v1681_v45 = vmul.f32 -1.442695, %v1152_v55 }
0x1164   :  { %v1076_v56 = vpop.f32.mrf.mxu0 }
0x1166   :  { %v1077_v57 = vpop.f32.mrf.mxu0 }
0x1168   :  { %v1120_v59 = vpop.f32.mrf.mxu1 }
0x1169   :  { %v1126_v60 = vadd.f32 %v1120_v59, %v1079_v58 }
0x116a   :  { %v1809_v61 = vpop.f32.mrf.mxu1 }
0x116b   :  { %1984 = vtanh.f32 %v1126_v60  ;;  %v1680_v2 = vmul.f32 -1.442695, %v1126_v60 }
0x116c   :  { %v1123_v62 = vpop.f32.mrf.mxu1  ;;  %1986 = vpow2.f32 %v1681_v45 }
0x116d   :  { %1988 = vpow2.f32 %v1680_v2 }
0x116e   :  { %v1810_v63 = vpop.f32.mrf.mxu1 }
0x1170   :  { %v1983_v0 = vpop.eup %1982 }
0x1171   :  { %1162 = vrot.lane.b32.xlu0 %v1983_v0, %s2154_s7 }
0x1178   :  { %v1985_v1 = vpop.eup %1984 }
0x1179   :  { %1136 = vrot.lane.b32.xlu1 %v1985_v1, %s2154_s7  ;;  %v1987_v3 = vpop.eup %1986 }
0x117a   :  { %v1156_v4 = vadd.f32 1.0, %v1987_v3  ;;  %v1989_v6 = vpop.eup %1988 }
0x117b   :  { %v1130_v5 = vadd.f32 1.0, %v1989_v6 }
0x117c   :  { %1990 = vrcp.f32 %v1156_v4 }
0x117d   :  { %1992 = vrcp.f32 %v1130_v5 }
0x1189   :  { %v1991_v7 = vpop.eup %1990 }
0x118a   :  { %v1993_v10 = vpop.eup %1992  ;;  %v1160_v48 = vmul.f32 %v1991_v7, %v2509_v32 }
0x118b   :  { %v1134_v18 = vmul.f32 %v1993_v10, %v2513_v38 }
0x11e3   :  { %v1163_v8 = vpop.permute.xlu0 %1162 }
0x11e4   :  { %v1165_v9 = vmul.f32 %v1991_v7, %v1163_v8 }
0x11e6   :  { %1167 = vrot.lane.b32.xlu0 %v1165_v9, %s2159_s1 }
0x11eb   :  { %v1137_v11 = vpop.permute.xlu1 %1136 }
0x11ec   :  { %v1139_v14 = vmul.f32 %v1993_v10, %v1137_v11 }
0x11ee   :  { %1141 = vrot.lane.b32.xlu1 %v1139_v14, %s2159_s1 }
0x1258   :  { %v1168_v17 = vpop.permute.xlu0 %1167 }
0x1259   :  { %v2541_v12 = vadd.f32 %v1168_v17, %v1160_v48 }
0x125b   :  { %1994 = vtanh.f32 %v2541_v12 }
0x1260   :  { %v1142_v19 = vpop.permute.xlu1 %1141 }
0x1261   :  { %v2545_v20 = vadd.f32 %v1142_v19, %v1134_v18 }
0x1263   :  { %1996 = vtanh.f32 %v2545_v20 }
0x1268   :  { %v1995_v21 = vpop.eup %1994 }
0x1269   :  { %1173 = vrot.lane.b32.xlu0 %v1995_v21, %s2154_s7 }
0x1270   :  { %v1997_v22 = vpop.eup %1996 }
0x1271   :  { %1147 = vrot.lane.b32.xlu1 %v1997_v22, %s2154_s7 }
0x12db   :  { %v1174_v23 = vpop.permute.xlu0 %1173 }
0x12dc   :  { %v1176_v25 = vmul.f32 %v1991_v7, %v1174_v23 }
0x12de   :  { %v1177_v46 = vpack.c.bf16 %v1176_v25, %v1176_v25 }
0x12e0   :  { %1179 = vrot.lane.b32.xlu0 %v1177_v46, %s2159_s1 }
0x12e3   :  { %v1148_v27 = vpop.permute.xlu1 %1147 }
0x12e4   :  { %v1150_v28 = vmul.f32 %v1993_v10, %v1148_v27 }
0x12e6   :  { %v1151_v31 = vpack.c.bf16 %v1150_v28, %v1150_v28 }
0x12e8   :  { %1227 = vrot.lane.b32.xlu1 %v1151_v31, %s2159_s1 }
0x1352   :  { %v1180_v32 = vpop.permute.xlu0 %1179 }
0x1353   :  { %1682 = vmatmul.mubr.msk.bf16.vlgmr.msra.gmra.mxu0 %vm333_vm12, %v1180_v32 }
0x1354   :  { %1343 = vmatpush1.bf16.msra.mxu0 %v2302_v30  ;;  %1362 = vmatprep.mubr.bf16.mxu0 %v2160_v35  ;;  %v273_v30 = vadd.f32 %v2357_v47, %v2286_v16 }
0x1355   :  { %1344 = vmatprep.subr.bf16.mxu0 %v2325_v36 }
0x1358   :  { %1345 = vmatpush1.bf16.msra.mxu0 %v2332_v37 }
0x1359   :  { %1827 = vmatprep.subr.bf16.mxu0 %v2161_v13 }
0x135a   :  { %v1228_v33 = vpop.permute.xlu1 %1227 }
0x135b   :  { %1816 = vmatmul.mubr.msk.bf16.vlgmr.msra.gmra.mxu1 %vm333_vm12, %v1228_v33  ;;  %v1884_v33 = vld [vmem:[#allocation6 + $0x8] sm:$0xff]  }
0x135c   :  { %1820 = vmatpush3.bf16.msra.mxu1 %v2384_v24  ;;  %1823 = vmatprep.mubr.msk.bf16.mxu1 %vm2162_vm13, %v2161_v13 }
0x135d   :  { %1821 = vmatprep.subr.bf16.mxu1 %v2161_v13 }
0x1360   :  { %1822 = vmatpush3.bf16.msra.mxu1 %v2391_v26 }
0x1361   :  { %1835 = vmatprep.subr.bf16.mxu1 %v2161_v13 }
0x1413   :  { %v1218_v35 = vpop.f32.mrf.mxu0 }
0x1414   :  { %v1298_v36 = vadd.f32 %v1218_v35, %v273_v30  ;;  %v1885_v30 = vld [vmem:[#allocation6] sm:$0xff]  }
0x1415   :  { %v1220_v37 = vpop.f32.mrf.mxu0 }
0x1416   :  { %1998 = vtanh.f32 %v1298_v36  ;;  %v1225_v24 = vadd.f32 %v2362_v51, %v1220_v37  ;;  %v1685_v16 = vmul.f32 -1.442695, %v1298_v36  ;;  %v1886_v36 = vld [vmem:[#allocation9 + $0x38] sm:$0xff]   ;;  %v1887_v37 = vld [vmem:[#allocation9 + $0x30] sm:$0xff]  }
0x1417   :  { %v1222_v34 = vpop.f32.mrf.mxu0 }
0x1418   :  { %v1888_v34 = vld [vmem:[#allocation9 + $0x28] sm:$0xff]  }
0x1419   :  { %v1223_v38 = vpop.f32.mrf.mxu0 }
0x141b   :  { %v1266_v39 = vpop.f32.mrf.mxu1 }
0x141c   :  { %v1272_v43 = vadd.f32 %v1266_v39, %v1225_v24  ;;  %v1889_v39 = vld [vmem:[#allocation9 + $0x20] sm:$0xff]  }
0x141d   :  { %v1817_v40 = vpop.f32.mrf.mxu1 }
0x141e   :  { %2000 = vtanh.f32 %v1272_v43  ;;  %v1684_v47 = vmul.f32 -1.442695, %v1272_v43  ;;  %v1890_v40 = vld [vmem:[#allocation9 + $0x18] sm:$0xff]  }
0x141f   :  { %v1269_v41 = vpop.f32.mrf.mxu1  ;;  %2002 = vpow2.f32 %v1685_v16  ;;  %v1689_v16 = vld [vmem:[#allocation7] ss:$0 sm:$0xff] }
0x1420   :  { %2004 = vpow2.f32 %v1684_v47  ;;  %v1891_v41 = vld [vmem:[#allocation9 + $0x10] sm:$0xff]  }
0x1421   :  { %v1818_v42 = vpop.f32.mrf.mxu1 }
0x1423   :  { %v1999_v26 = vpop.eup %1998 }
0x1424   :  { %1308 = vrot.lane.b32.xlu0 %v1999_v26, %s2154_s7  ;;  %v1892_v26 = vld [vmem:[#allocation9 + $0x8] sm:$0xff]  }
0x142b   :  { %v2001_v44 = vpop.eup %2000 }
0x142c   :  { %1282 = vrot.lane.b32.xlu1 %v2001_v44, %s2154_s7  ;;  %v2003_v49 = vpop.eup %2002  ;;  %v1893_v44 = vld [vmem:[#allocation9] sm:$0xff]  }
0x142d   :  { %v1302_v50 = vadd.f32 1.0, %v2003_v49  ;;  %v2005_v52 = vpop.eup %2004 }
0x142e   :  { %v1276_v15 = vadd.f32 1.0, %v2005_v52 }
0x142f   :  { %2006 = vrcp.f32 %v1302_v50 }
0x1430   :  { %2008 = vrcp.f32 %v1276_v15 }
0x143c   :  { %v2007_v53 = vpop.eup %2006 }
0x143d   :  { %v2009_v29 = vpop.eup %2008  ;;  %v1306_v58 = vmul.f32 %v2007_v53, %v2541_v12 }
0x143e   :  { %v1280_v61 = vmul.f32 %v2009_v29, %v2545_v20 }
0x1496   :  { %v1309_v54 = vpop.permute.xlu0 %1308 }
0x1497   :  { %v1311_v55 = vmul.f32 %v2007_v53, %v1309_v54 }
0x1499   :  { %1313 = vrot.lane.b32.xlu0 %v1311_v55, %s2159_s1  ;;  %v1693_v55 = vld [vmem:[#allocation10] ss:$0 sm:$0xff] }
0x149e   :  { %v1283_v56 = vpop.permute.xlu1 %1282 }
0x149f   :  { %v1285_v57 = vmul.f32 %v2009_v29, %v1283_v56 }
0x14a1   :  { %1287 = vrot.lane.b32.xlu1 %v1285_v57, %s2159_s1 }
0x150b   :  { %v1314_v59 = vpop.permute.xlu0 %1313 }
0x150c   :  { %v1316_v60 = vadd.f32 %v1314_v59, %v1306_v58 }
0x150e   :  { %2010 = vtanh.f32 %v1316_v60 }
0x1513   :  { %v1288_v62 = vpop.permute.xlu1 %1287 }
0x1514   :  { %v1290_v63 = vadd.f32 %v1288_v62, %v1280_v61 }
0x1516   :  { %2012 = vtanh.f32 %v1290_v63 }
0x151b   :  { %v2011_v0 = vpop.eup %2010 }
0x151c   :  { %1319 = vrot.lane.b32.xlu0 %v2011_v0, %s2154_s7 }
0x1523   :  { %v2013_v1 = vpop.eup %2012 }
0x1524   :  { %1293 = vrot.lane.b32.xlu1 %v2013_v1, %s2154_s7 }
0x158e   :  { %v1320_v45 = vpop.permute.xlu0 %1319 }
0x158f   :  { %v1322_v2 = vmul.f32 %v2007_v53, %v1320_v45 }
0x1591   :  { %v1323_v3 = vpack.c.bf16 %v1322_v2, %v1322_v2 }
0x1593   :  { %1325 = vrot.lane.b32.xlu0 %v1323_v3, %s2159_s1 }
0x1596   :  { %v1294_v4 = vpop.permute.xlu1 %1293 }
0x1597   :  { %v1296_v6 = vmul.f32 %v2009_v29, %v1294_v4 }
0x1599   :  { %v1297_v5 = vpack.c.bf16 %v1296_v6, %v1296_v6 }
0x159b   :  { %1372 = vrot.lane.b32.xlu1 %v1297_v5, %s2159_s1 }
0x1605   :  { %v1326_v7 = vpop.permute.xlu0 %1325 }
0x1606   :  { %1686 = vmatmul.mubr.msk.bf16.vlgmr.msra.gmra.mxu0 %vm333_vm12, %v1326_v7 }
0x1607   :  { %1831 = vmatprep.mubr.msk.bf16.mxu0 %vm2162_vm13, %v2161_v13  ;;  %1828 = vmatpush3.bf16.msra.mxu0 %v1884_v33 }
0x1608   :  { %1829 = vmatprep.subr.bf16.mxu0 %v2161_v13 }
0x160b   :  { %1830 = vmatpush3.bf16.msra.mxu0 %v1885_v30 }
0x160d   :  { %v1373_v8 = vpop.permute.xlu1 %1372 }
0x160e   :  { %1824 = vmatmul.mubr.msk.bf16.vlgmr.msra.gmra.mxu1 %vm333_vm12, %v1373_v8 }
0x160f   :  { %1851 = vmatprep.mubr.msk.bf16.mxu1 %vm2162_vm13, %v2161_v13  ;;  %1836 = vmatpush3.bf16.msra.mxu1 %v1886_v36 }
0x1610   :  { %1837 = vmatprep.subr.bf16.mxu1 %v2161_v13 }
0x1613   :  { %1838 = vmatpush3.bf16.msra.mxu1 %v1887_v37 }
0x1614   :  { %1839 = vmatprep.subr.bf16.mxu1 %v2161_v13 }
0x1617   :  { %1840 = vmatpush3.bf16.msra.mxu1 %v1888_v34 }
0x1618   :  { %1841 = vmatprep.subr.bf16.mxu1 %v2161_v13 }
0x161b   :  { %1842 = vmatpush3.bf16.msra.mxu1 %v1889_v39 }
0x161c   :  { %1843 = vmatprep.subr.bf16.mxu1 %v2161_v13 }
0x161f   :  { %1844 = vmatpush3.bf16.msra.mxu1 %v1890_v40 }
0x1620   :  { %1845 = vmatprep.subr.bf16.mxu1 %v2161_v13 }
0x1623   :  { %1846 = vmatpush3.bf16.msra.mxu1 %v1891_v41 }
0x1624   :  { %1847 = vmatprep.subr.bf16.mxu1 %v2161_v13 }
0x1627   :  { %1848 = vmatpush3.bf16.msra.mxu1 %v1892_v26 }
0x1628   :  { %1849 = vmatprep.subr.bf16.mxu1 %v2161_v13 }
0x162b   :  { %1850 = vmatpush3.bf16.msra.mxu1 %v1893_v44 }
0x16c6   :  { %v1364_v9 = vpop.f32.mrf.mxu0 }
0x16c8   :  { %v1365_v10 = vpop.f32.mrf.mxu0 }
0x16c9   :  { %v1370_v48 = vadd.f32 %v2362_v51, %v1365_v10 }
0x16ca   :  { %v1367_v11 = vpop.f32.mrf.mxu0 }
0x16cc   :  { %v1368_v14 = vpop.f32.mrf.mxu0 }
0x16ce   :  { %v1411_v17 = vpop.f32.mrf.mxu1 }
0x16cf   :  { %v1417_v12 = vadd.f32 %v1411_v17, %v1370_v48 }
0x16d0   :  { %v1825_v18 = vpop.f32.mrf.mxu1 }
0x16d1   :  { %2014 = vtanh.f32 %v1417_v12  ;;  %v1688_v22 = vmul.f32 -1.442695, %v1417_v12 }
0x16d2   :  { %v1414_v19 = vpop.f32.mrf.mxu1 }
0x16d3   :  { %2016 = vpow2.f32 %v1688_v22 }
0x16d4   :  { %v1826_v20 = vpop.f32.mrf.mxu1 }
0x16de   :  { %v2015_v21 = vpop.eup %2014 }
0x16df   :  { %1427 = vrot.lane.b32.xlu0 %v2015_v21, %s2154_s7 }
0x16e0   :  { %v2017_v23 = vpop.eup %2016 }
0x16e1   :  { %v1421_v25 = vadd.f32 1.0, %v2017_v23 }
0x16e3   :  { %2018 = vrcp.f32 %v1421_v25 }
0x16f0   :  { %v2019_v46 = vpop.eup %2018 }
0x16f1   :  { %v1425_v51 = vmul.f32 %v2019_v46, %v1290_v63 }
0x1751   :  { %v1428_v27 = vpop.permute.xlu0 %1427 }
0x1752   :  { %v1430_v28 = vmul.f32 %v2019_v46, %v1428_v27 }
0x1754   :  { %1432 = vrot.lane.b32.xlu1 %v1430_v28, %s2159_s1 }
0x17c6   :  { %v1433_v31 = vpop.permute.xlu1 %1432 }
0x17c7   :  { %v1435_v32 = vadd.f32 %v1433_v31, %v1425_v51 }
0x17c9   :  { %2020 = vtanh.f32 %v1435_v32 }
0x17d6   :  { %v2021_v35 = vpop.eup %2020 }
0x17d7   :  { %1438 = vrot.lane.b32.xlu0 %v2021_v35, %s2154_s7 }
0x1849   :  { %v1439_v38 = vpop.permute.xlu0 %1438 }
0x184a   :  { %v1441_v24 = vmul.f32 %v2019_v46, %v1439_v38 }
0x184c   :  { %v1442_v43 = vpack.c.bf16 %v1441_v24, %v1441_v24 }
0x184e   :  { %1455 = vrot.lane.b32.xlu1 %v1442_v43, %s2159_s1 }
0x18c0   :  { %v1456_v42 = vpop.permute.xlu1 %1455 }
0x18c1   :  { %1832 = vmatmul.mubr.msk.bf16.vlgmr.msra.gmra.mxu0 %vm333_vm12, %v1456_v42 }
0x1981   :  { %v1506_v47 = vpop.f32.mrf.mxu0 }
0x1982   :  { %v1507_v49 = vadd.f32 %v1689_v16, %v1506_v47 }
0x1983   :  { %v1833_v50 = vpop.f32.mrf.mxu0 }
0x1984   :  { %v1512_v52 = vmax.f32 %v1507_v49, 0.0 }
0x1985   :  { %v1509_v15 = vpop.f32.mrf.mxu0 }
0x1986   :  { %v1513_v53 = vpack.c.bf16 %v1512_v52, %v1512_v52 }
0x1987   :  { %v1834_v54 = vpop.f32.mrf.mxu0 }
0x1988   :  { %1852 = vmatmul.mubr.bf16.vlgmr.msra.gmra.mxu1 %v1513_v53 }
0x1a48   :  { %v1619_v29 = vpop.f32.mrf.mxu1 }
0x1a49   :  { %v1620_v56 = vadd.f32 %v1693_v55, %v1619_v29 }
0x1a4a   :  { %v1853_v57 = vpop.f32.mrf.mxu1 }
0x1a4b   :  { %1625 = vst [vmem:[%s2611_s10] sm:$0xff] %v1620_v56 }
0x1a4c   :  { %v1622_v13 = vpop.f32.mrf.mxu1 }
0x1a4e   :  { %v1854_v58 = vpop.f32.mrf.mxu1 }
0x1a4f   :  { %1630 = vsyncpa [#allocation3], 1 }
0x1a50   :  { %1631 = vsyncpa [#allocation5], 1 }
0x1a51   :  { %1632 = vsyncpa [#allocation8], 1 }
0x1a52   :  { %1633 = vsyncpa [#allocation11], 1 }

</bundles_post_ra>
